<compile_context>
chip_gen: v7x
topology: tpu7x:2x2x1
jax: 0.10.0
libtpu: 0.0.40
codegen_flags: <defaults>
</compile_context>

<pallas_src>
import math

import jax
import jax.numpy as jnp
from jax import lax
from jax.experimental import pallas as pl
from jax.experimental.pallas import tpu as pltpu

# ----------------------------- configuration --------------------------------
DIM = 32                      # channels
H = W = 8                     # input_resolution
NUM_HEADS = 4
WINDOW = 4                    # window_size
SHIFT = 2                     # shift_size
MLP_RATIO = 4.0
BATCH = 2

L = H * W                     # tokens per image
N = WINDOW * WINDOW           # tokens per window
HEAD_DIM = DIM // NUM_HEADS
SCALE = HEAD_DIM ** (-0.5)
HIDDEN = int(DIM * MLP_RATIO)
EPS = 1e-5                    # PyTorch LayerNorm default
NW = (H // WINDOW) * (W // WINDOW)
NEG = -1e9                    # "outside this window" additive mask


# ------------------------------- glue (JAX) ---------------------------------
def window_partition(x, ws):
    B, Hh, Ww, C = x.shape
    x = x.reshape(B, Hh // ws, ws, Ww // ws, ws, C)
    return x.transpose(0, 1, 3, 2, 4, 5).reshape(-1, ws, ws, C)


def window_reverse(windows, ws, Hh, Ww):
    B = windows.shape[0] // (Hh * Ww // ws // ws)
    x = windows.reshape(B, Hh // ws, Ww // ws, ws, ws, -1)
    return x.transpose(0, 1, 3, 2, 4, 5).reshape(B, Hh, Ww, -1)


def relative_position_index(ws):
    coords = jnp.stack(jnp.meshgrid(jnp.arange(ws), jnp.arange(ws), indexing="ij"))
    cf = coords.reshape(2, -1)
    rel = cf[:, :, None] - cf[:, None, :]          # (2, N, N)
    rel = rel.transpose(1, 2, 0)
    rel = rel.at[:, :, 0].add(ws - 1)
    rel = rel.at[:, :, 1].add(ws - 1)
    rel = rel.at[:, :, 0].multiply(2 * ws - 1)
    return rel.sum(-1)                             # (N, N) int32


def build_attn_mask(Hh, Ww, ws, shift):
    if shift == 0:
        return jnp.zeros((NW, N, N), jnp.float32)
    img_mask = jnp.zeros((1, Hh, Ww, 1), jnp.float32)
    h_slices = (slice(0, -ws), slice(-ws, -shift), slice(-shift, None))
    w_slices = (slice(0, -ws), slice(-ws, -shift), slice(-shift, None))
    cnt = 0
    for hs in h_slices:
        for wsl in w_slices:
            img_mask = img_mask.at[:, hs, wsl, :].set(float(cnt))
            cnt += 1
    mask_windows = window_partition(img_mask, ws).reshape(-1, ws * ws)
    attn_mask = mask_windows[:, None, :] - mask_windows[:, :, None]
    return jnp.where(attn_mask != 0, -100.0, 0.0).astype(jnp.float32)


def build_full_bias(rel_bias, attn_mask):
    """Fold shift-roll + window partition/reverse + rel-pos bias + shift mask
    into one (NUM_HEADS, L, L) additive bias in ORIGINAL spatial row order."""
    rows = jnp.arange(L) // W
    cols = jnp.arange(L) % W
    sr = (rows - SHIFT) % H                        # position after roll(-SHIFT)
    sc = (cols - SHIFT) % W
    win = (sr // WINDOW) * (W // WINDOW) + sc // WINDOW      # window id  (L,)
    loc = (sr % WINDOW) * WINDOW + sc % WINDOW               # in-window id (L,)
    same = win[:, None] == win[None, :]                      # (L, L)
    rel = rel_bias[:, loc[:, None], loc[None, :]]            # (heads, L, L)
    shift_m = attn_mask[win[:, None], loc[:, None], loc[None, :]]   # (L, L)
    bias = rel + shift_m[None]
    return jnp.where(same[None], bias, NEG).astype(jnp.float32)


# ----------------------------- Pallas kernel ---------------------------------
def _swin_block_kernel(x_ref, bias_ref, g1_ref, b1_ref, wqkv_ref, bqkv_ref,
                       wproj_ref, bproj_ref, g2_ref, b2_ref,
                       w1_ref, bb1_ref, w2_ref, bb2_ref, o_ref):
    # One batch element per grid step: a full (L=64, C=32) slab.
    x = x_ref[0].astype(jnp.float32)                                  # (L, C)

    # ---- LayerNorm1 (per token; commutes with the window permutation) ----
    mu = jnp.mean(x, axis=-1, keepdims=True)
    var = jnp.mean((x - mu) ** 2, axis=-1, keepdims=True)
    xn = (x - mu) * lax.rsqrt(var + EPS) * g1_ref[...] + b1_ref[...]

    # ---- QKV for all 64 tokens at once: (64,32) x (32,96) ----
    qkv = jnp.dot(xn, wqkv_ref[...], preferred_element_type=jnp.float32) + bqkv_ref[...]

    # head split -> (NUM_HEADS, L, HEAD_DIM)
    q = jnp.stack([qkv[:, h * HEAD_DIM:(h + 1) * HEAD_DIM]
                   for h in range(NUM_HEADS)], axis=0) * SCALE
    k = jnp.stack([qkv[:, DIM + h * HEAD_DIM: DIM + (h + 1) * HEAD_DIM]
                   for h in range(NUM_HEADS)], axis=0)
    v = jnp.stack([qkv[:, 2 * DIM + h * HEAD_DIM: 2 * DIM + (h + 1) * HEAD_DIM]
                   for h in range(NUM_HEADS)], axis=0)

    # ---- heads-batched attention over all 64 tokens; the precomputed bias
    #      carries rel-pos bias + shift mask + out-of-window -inf, so the
    #      result is exactly windowed attention in original token order. ----
    s = jnp.einsum('hnd,hmd->hnm', q, k, preferred_element_type=jnp.float32)  # (h, L, L)
    s = s + bias_ref[...]
    s = s - jnp.max(s, axis=-1, keepdims=True)
    p = jnp.exp(s)
    # exact divide (pl.reciprocal(approx=True) would free VALU slots but costs
    # ~1e-3 relative error; kept exact to hold the 1e-4 correctness check).
    p = p / jnp.sum(p, axis=-1, keepdims=True)
    o = jnp.einsum('hnm,hmd->hnd', p, v, preferred_element_type=jnp.float32)  # (h, L, hd)
    o = jnp.concatenate([o[h] for h in range(NUM_HEADS)], axis=-1)            # (L, C)
    attn = jnp.dot(o, wproj_ref[...], preferred_element_type=jnp.float32) + bproj_ref[...]

    x1 = x + attn                                                     # residual 1 (fused)

    # ---- LayerNorm2 + MLP (NewGELU tanh) + residual, all fused ----
    mu2 = jnp.mean(x1, axis=-1, keepdims=True)
    var2 = jnp.mean((x1 - mu2) ** 2, axis=-1, keepdims=True)
    xn2 = (x1 - mu2) * lax.rsqrt(var2 + EPS) * g2_ref[...] + b2_ref[...]
    hdn = jnp.dot(xn2, w1_ref[...], preferred_element_type=jnp.float32) + bb1_ref[...]
    c = math.sqrt(2.0 / math.pi)
    hdn = 0.5 * hdn * (1.0 + jnp.tanh(c * (hdn + 0.044715 * hdn ** 3)))
    y = jnp.dot(hdn, w2_ref[...], preferred_element_type=jnp.float32) + bb2_ref[...]

    o_ref[0] = (x1 + y).astype(o_ref.dtype)


# ----------------------------- Pallas wrapper --------------------------------
def swin_block_forward(x, p, full_bias):
    B = x.shape[0]
    rep2 = lambda b: (0, 0)   # replicated weight/bias operands
    return pl.pallas_call(
        _swin_block_kernel,
        out_shape=jax.ShapeDtypeStruct((B, L, DIM), x.dtype),
        grid=(B,),
        in_specs=[
            pl.BlockSpec((1, L, DIM), lambda b: (b, 0, 0)),           # x
            pl.BlockSpec((NUM_HEADS, L, L), lambda b: (0, 0, 0)),     # fused bias+mask
            pl.BlockSpec((1, DIM), rep2),                             # g1
            pl.BlockSpec((1, DIM), rep2),                             # b1
            pl.BlockSpec((DIM, 3 * DIM), rep2),                       # wqkv
            pl.BlockSpec((1, 3 * DIM), rep2),                         # bqkv
            pl.BlockSpec((DIM, DIM), rep2),                           # wproj
            pl.BlockSpec((1, DIM), rep2),                             # bproj
            pl.BlockSpec((1, DIM), rep2),                             # g2
            pl.BlockSpec((1, DIM), rep2),                             # b2
            pl.BlockSpec((DIM, HIDDEN), rep2),                        # w1
            pl.BlockSpec((1, HIDDEN), rep2),                          # bb1
            pl.BlockSpec((HIDDEN, DIM), rep2),                        # w2
            pl.BlockSpec((1, DIM), rep2),                             # bb2
        ],
        out_specs=pl.BlockSpec((1, L, DIM), lambda b: (b, 0, 0)),
        compiler_params=pltpu.CompilerParams(dimension_semantics=("parallel",)),
    )(x, full_bias, p["g1"], p["b1"], p["wqkv"], p["bqkv"], p["wproj"], p["bproj"],
      p["g2"], p["b2"], p["w1"], p["bb1"], p["w2"], p["bb2"])


# ------------------------- pure-JAX reference ---------------------------------
def _layernorm(x, g, b):
    mu = jnp.mean(x, -1, keepdims=True)
    var = jnp.mean((x - mu) ** 2, -1, keepdims=True)
    return (x - mu) * lax.rsqrt(var + EPS) * g + b


def reference_forward(x, p, attn_mask):
    B, Ltok, C = x.shape
    shortcut = x
    xn = _layernorm(x, p["g1"][0], p["b1"][0])
    xv = xn.reshape(B, H, W, C)
    if SHIFT > 0:
        xv = jnp.roll(xv, shift=(-SHIFT, -SHIFT), axis=(1, 2))
    xw = window_partition(xv, WINDOW).reshape(-1, N, C)
    Bw = xw.shape[0]

    qkv = (xw @ p["wqkv"] + p["bqkv"][0]).reshape(Bw, N, 3, NUM_HEADS, HEAD_DIM)
    qkv = qkv.transpose(2, 0, 3, 1, 4)
    q, k, v = qkv[0] * SCALE, qkv[1], qkv[2]
    attn = jnp.einsum("bhnd,bhmd->bhnm", q, k)
    attn = attn + p["rel_bias"][None]
    attn = attn.reshape(Bw // NW, NW, NUM_HEADS, N, N) + attn_mask[None, :, None]
    attn = attn.reshape(-1, NUM_HEADS, N, N)
    attn = jax.nn.softmax(attn, axis=-1)
    out = jnp.einsum("bhnm,bhmd->bhnd", attn, v).transpose(0, 2, 1, 3).reshape(Bw, N, C)
    out = out @ p["wproj"] + p["bproj"][0]

    out = window_reverse(out.reshape(-1, WINDOW, WINDOW, C), WINDOW, H, W)
    if SHIFT > 0:
        out = jnp.roll(out, shift=(SHIFT, SHIFT), axis=(1, 2))
    x = shortcut + out.reshape(B, Ltok, C)

    xn2 = _layernorm(x, p["g2"][0], p["b2"][0])
    h1 = xn2 @ p["w1"] + p["bb1"][0]
    c = math.sqrt(2.0 / math.pi)
    h1 = 0.5 * h1 * (1.0 + jnp.tanh(c * (h1 + 0.044715 * h1 ** 3)))
    return x + (h1 @ p["w2"] + p["bb2"][0])


# --------------------------------- main ---------------------------------------
def init_params(key):
    ks = jax.random.split(key, 10)
    # PyTorch inits the bias table to zeros; use small random values so the
    # rel-pos path is actually exercised.
    table = 0.02 * jax.random.normal(ks[0], ((2 * WINDOW - 1) ** 2, NUM_HEADS), jnp.float32)
    rpi = relative_position_index(WINDOW)                               # (N, N)
    rel_bias = table[rpi.reshape(-1)].reshape(N, N, NUM_HEADS).transpose(2, 0, 1)

    p = dict(
        g1=1.0 + 0.1 * jax.random.normal(ks[1], (1, DIM), jnp.float32),
        b1=0.1 * jax.random.normal(ks[2], (1, DIM), jnp.float32),
        wqkv=0.05 * jax.random.normal(ks[3], (DIM, 3 * DIM), jnp.float32),
        bqkv=0.02 * jax.random.normal(ks[4], (1, 3 * DIM), jnp.float32),
        rel_bias=rel_bias.astype(jnp.float32),
        wproj=0.05 * jax.random.normal(ks[5], (DIM, DIM), jnp.float32),
        bproj=0.02 * jax.random.normal(ks[6], (1, DIM), jnp.float32),
        g2=1.0 + 0.1 * jax.random.normal(ks[7], (1, DIM), jnp.float32),
        b2=0.1 * jax.random.normal(ks[8], (1, DIM), jnp.float32),
        w1=0.05 * jax.random.normal(ks[9], (DIM, HIDDEN), jnp.float32),
        bb1=jnp.zeros((1, HIDDEN), jnp.float32),
        w2=0.05 * jax.random.normal(jax.random.fold_in(key, 99), (HIDDEN, DIM), jnp.float32),
        bb2=jnp.zeros((1, DIM), jnp.float32),
    )
    return p


if __name__ == "__main__":
    key = jax.random.PRNGKey(0)
    kx, kp = jax.random.split(key)
    params = init_params(kp)
    attn_mask = build_attn_mask(H, W, WINDOW, SHIFT)                    # (nW, N, N)
    full_bias = build_full_bias(params["rel_bias"], attn_mask)          # (heads, L, L)

    x = jax.random.normal(kx, (BATCH, L, DIM), jnp.float32)             # (2, 64, 32)

    fwd = jax.jit(lambda xx: swin_block_forward(xx, params, full_bias))
    out = fwd(x)
    jax.block_until_ready(out)

    ref = reference_forward(x, params, attn_mask)
    assert out.shape == (BATCH, L, DIM)
    assert jnp.allclose(out, ref, atol=1e-4, rtol=1e-4), "mismatch vs pure-JAX reference"

    # TODO(synk): nn.Dropout layers (drop=attn_drop=0.0) are identity in eval mode; omitted.
    print("KERNEL_OK")
</pallas_src>

<mosaic_0001>
module attributes {stable_mosaic.version = 11 : i64} {
  func.func @_swin_block_kernel(%arg0: i32, %arg1: memref<1x64x32xf32, #tpu.memory_space<vmem>>, %arg2: memref<4x64x64xf32, #tpu.memory_space<vmem>>, %arg3: memref<1x32xf32, #tpu.memory_space<vmem>>, %arg4: memref<1x32xf32, #tpu.memory_space<vmem>>, %arg5: memref<32x96xf32, #tpu.memory_space<vmem>>, %arg6: memref<1x96xf32, #tpu.memory_space<vmem>>, %arg7: memref<32x32xf32, #tpu.memory_space<vmem>>, %arg8: memref<1x32xf32, #tpu.memory_space<vmem>>, %arg9: memref<1x32xf32, #tpu.memory_space<vmem>>, %arg10: memref<1x32xf32, #tpu.memory_space<vmem>>, %arg11: memref<32x128xf32, #tpu.memory_space<vmem>>, %arg12: memref<1x128xf32, #tpu.memory_space<vmem>>, %arg13: memref<128x32xf32, #tpu.memory_space<vmem>>, %arg14: memref<1x32xf32, #tpu.memory_space<vmem>>, %arg15: memref<1x64x32xf32, #tpu.memory_space<vmem>>) attributes {dimension_semantics = [#tpu.dimension_semantics<parallel>], iteration_bounds = array<i64: 2>, scalar_prefetch = 0 : i64, scratch_operands = 0 : i64, tpu.core_type = #tpu.core_type<tc>, window_params = [{transform_indices = @transform_0, window_bounds = array<i64: 1, 64, 32>}, {pipeline_mode = #tpu.pipeline_mode<synchronous>, transform_indices = @transform_1, window_bounds = array<i64: 4, 64, 64>}, {pipeline_mode = #tpu.pipeline_mode<synchronous>, transform_indices = @transform_2, window_bounds = array<i64: 1, 32>}, {pipeline_mode = #tpu.pipeline_mode<synchronous>, transform_indices = @transform_3, window_bounds = array<i64: 1, 32>}, {pipeline_mode = #tpu.pipeline_mode<synchronous>, transform_indices = @transform_4, window_bounds = array<i64: 32, 96>}, {pipeline_mode = #tpu.pipeline_mode<synchronous>, transform_indices = @transform_5, window_bounds = array<i64: 1, 96>}, {pipeline_mode = #tpu.pipeline_mode<synchronous>, transform_indices = @transform_6, window_bounds = array<i64: 32, 32>}, {pipeline_mode = #tpu.pipeline_mode<synchronous>, transform_indices = @transform_7, window_bounds = array<i64: 1, 32>}, {pipeline_mode = #tpu.pipeline_mode<synchronous>, transform_indices = @transform_8, window_bounds = array<i64: 1, 32>}, {pipeline_mode = #tpu.pipeline_mode<synchronous>, transform_indices = @transform_9, window_bounds = array<i64: 1, 32>}, {pipeline_mode = #tpu.pipeline_mode<synchronous>, transform_indices = @transform_10, window_bounds = array<i64: 32, 128>}, {pipeline_mode = #tpu.pipeline_mode<synchronous>, transform_indices = @transform_11, window_bounds = array<i64: 1, 128>}, {pipeline_mode = #tpu.pipeline_mode<synchronous>, transform_indices = @transform_12, window_bounds = array<i64: 128, 32>}, {pipeline_mode = #tpu.pipeline_mode<synchronous>, transform_indices = @transform_13, window_bounds = array<i64: 1, 32>}, {transform_indices = @transform_14, window_bounds = array<i64: 1, 64, 32>}]} {
    %c0 = arith.constant 0 : index
    %c0_0 = arith.constant 0 : index
    %c0_1 = arith.constant 0 : index
    %0 = vector.load %arg1[%c0, %c0_0, %c0_1] : memref<1x64x32xf32, #tpu.memory_space<vmem>>, vector<1x64x32xf32>
    %1 = vector.shape_cast %0 : vector<1x64x32xf32> to vector<64x32xf32>
    %cst = arith.constant dense<0.000000e+00> : vector<64xf32>
    %2 = vector.multi_reduction <add>, %1, %cst [1] : vector<64x32xf32> to vector<64xf32>
    %3 = vector.shape_cast %2 : vector<64xf32> to vector<64x1xf32>
    %cst_2 = arith.constant 3.200000e+01 : f32
    %4 = vector.broadcast %cst_2 : f32 to vector<64x1xf32>
    %5 = arith.divf %3, %4 : vector<64x1xf32>
    %6 = vector.broadcast %5 : vector<64x1xf32> to vector<64x32xf32>
    %7 = arith.subf %1, %6 : vector<64x32xf32>
    %8 = arith.mulf %7, %7 : vector<64x32xf32>
    %cst_3 = arith.constant dense<0.000000e+00> : vector<64xf32>
    %9 = vector.multi_reduction <add>, %8, %cst_3 [1] : vector<64x32xf32> to vector<64xf32>
    %10 = vector.shape_cast %9 : vector<64xf32> to vector<64x1xf32>
    %cst_4 = arith.constant 3.200000e+01 : f32
    %11 = vector.broadcast %cst_4 : f32 to vector<64x1xf32>
    %12 = arith.divf %10, %11 : vector<64x1xf32>
    %13 = vector.broadcast %5 : vector<64x1xf32> to vector<64x32xf32>
    %14 = arith.subf %1, %13 : vector<64x32xf32>
    %cst_5 = arith.constant 9.99999974E-6 : f32
    %15 = vector.broadcast %cst_5 : f32 to vector<64x1xf32>
    %16 = arith.addf %12, %15 : vector<64x1xf32>
    %17 = math.rsqrt %16 : vector<64x1xf32>
    %18 = vector.broadcast %17 : vector<64x1xf32> to vector<64x32xf32>
    %19 = arith.mulf %14, %18 : vector<64x32xf32>
    %c0_6 = arith.constant 0 : index
    %c0_7 = arith.constant 0 : index
    %20 = vector.load %arg3[%c0_6, %c0_7] : memref<1x32xf32, #tpu.memory_space<vmem>>, vector<1x32xf32>
    %21 = vector.broadcast %20 : vector<1x32xf32> to vector<64x32xf32>
    %22 = arith.mulf %19, %21 : vector<64x32xf32>
    %c0_8 = arith.constant 0 : index
    %c0_9 = arith.constant 0 : index
    %23 = vector.load %arg4[%c0_8, %c0_9] : memref<1x32xf32, #tpu.memory_space<vmem>>, vector<1x32xf32>
    %24 = vector.broadcast %23 : vector<1x32xf32> to vector<64x32xf32>
    %25 = arith.addf %22, %24 : vector<64x32xf32>
    %c0_10 = arith.constant 0 : index
    %c0_11 = arith.constant 0 : index
    %26 = vector.load %arg5[%c0_10, %c0_11] : memref<32x96xf32, #tpu.memory_space<vmem>>, vector<32x96xf32>
    %cst_12 = arith.constant dense<0.000000e+00> : vector<64x96xf32>
    %27 = tpu.matmul %25, %26, %cst_12 {dimension_numbers = #tpu.dot_dimension_numbers<[1], [0], [0], [1], [0, 0, 1, 1], [], []>} : vector<64x32xf32>, vector<32x96xf32>, vector<64x96xf32> -> vector<64x96xf32>
    %c0_13 = arith.constant 0 : index
    %c0_14 = arith.constant 0 : index
    %28 = vector.load %arg6[%c0_13, %c0_14] : memref<1x96xf32, #tpu.memory_space<vmem>>, vector<1x96xf32>
    %29 = vector.broadcast %28 : vector<1x96xf32> to vector<64x96xf32>
    %30 = arith.addf %27, %29 : vector<64x96xf32>
    %31 = vector.extract_strided_slice %30 {offsets = [0, 0], sizes = [64, 8], strides = [1, 1]} : vector<64x96xf32> to vector<64x8xf32>
    %32 = vector.extract_strided_slice %30 {offsets = [0, 8], sizes = [64, 8], strides = [1, 1]} : vector<64x96xf32> to vector<64x8xf32>
    %33 = vector.extract_strided_slice %30 {offsets = [0, 16], sizes = [64, 8], strides = [1, 1]} : vector<64x96xf32> to vector<64x8xf32>
    %34 = vector.extract_strided_slice %30 {offsets = [0, 24], sizes = [64, 8], strides = [1, 1]} : vector<64x96xf32> to vector<64x8xf32>
    %35 = vector.shape_cast %31 : vector<64x8xf32> to vector<1x64x8xf32>
    %36 = vector.shape_cast %32 : vector<64x8xf32> to vector<1x64x8xf32>
    %37 = vector.shape_cast %33 : vector<64x8xf32> to vector<1x64x8xf32>
    %38 = vector.shape_cast %34 : vector<64x8xf32> to vector<1x64x8xf32>
    %39 = tpu.concatenate %35, %36, %37, %38 in 0 : vector<1x64x8xf32>, vector<1x64x8xf32>, vector<1x64x8xf32>, vector<1x64x8xf32> -> vector<4x64x8xf32>
    %cst_15 = arith.constant 0.353553385 : f32
    %40 = vector.broadcast %cst_15 : f32 to vector<4x64x8xf32>
    %41 = arith.mulf %39, %40 : vector<4x64x8xf32>
    %42 = vector.extract_strided_slice %30 {offsets = [0, 32], sizes = [64, 8], strides = [1, 1]} : vector<64x96xf32> to vector<64x8xf32>
    %43 = vector.extract_strided_slice %30 {offsets = [0, 40], sizes = [64, 8], strides = [1, 1]} : vector<64x96xf32> to vector<64x8xf32>
    %44 = vector.extract_strided_slice %30 {offsets = [0, 48], sizes = [64, 8], strides = [1, 1]} : vector<64x96xf32> to vector<64x8xf32>
    %45 = vector.extract_strided_slice %30 {offsets = [0, 56], sizes = [64, 8], strides = [1, 1]} : vector<64x96xf32> to vector<64x8xf32>
    %46 = vector.shape_cast %42 : vector<64x8xf32> to vector<1x64x8xf32>
    %47 = vector.shape_cast %43 : vector<64x8xf32> to vector<1x64x8xf32>
    %48 = vector.shape_cast %44 : vector<64x8xf32> to vector<1x64x8xf32>
    %49 = vector.shape_cast %45 : vector<64x8xf32> to vector<1x64x8xf32>
    %50 = tpu.concatenate %46, %47, %48, %49 in 0 : vector<1x64x8xf32>, vector<1x64x8xf32>, vector<1x64x8xf32>, vector<1x64x8xf32> -> vector<4x64x8xf32>
    %51 = vector.extract_strided_slice %30 {offsets = [0, 64], sizes = [64, 8], strides = [1, 1]} : vector<64x96xf32> to vector<64x8xf32>
    %52 = vector.extract_strided_slice %30 {offsets = [0, 72], sizes = [64, 8], strides = [1, 1]} : vector<64x96xf32> to vector<64x8xf32>
    %53 = vector.extract_strided_slice %30 {offsets = [0, 80], sizes = [64, 8], strides = [1, 1]} : vector<64x96xf32> to vector<64x8xf32>
    %54 = vector.extract_strided_slice %30 {offsets = [0, 88], sizes = [64, 8], strides = [1, 1]} : vector<64x96xf32> to vector<64x8xf32>
    %55 = vector.shape_cast %51 : vector<64x8xf32> to vector<1x64x8xf32>
    %56 = vector.shape_cast %52 : vector<64x8xf32> to vector<1x64x8xf32>
    %57 = vector.shape_cast %53 : vector<64x8xf32> to vector<1x64x8xf32>
    %58 = vector.shape_cast %54 : vector<64x8xf32> to vector<1x64x8xf32>
    %59 = tpu.concatenate %55, %56, %57, %58 in 0 : vector<1x64x8xf32>, vector<1x64x8xf32>, vector<1x64x8xf32>, vector<1x64x8xf32> -> vector<4x64x8xf32>
    "tpu.trace_start"() <{level = 10 : i32, message = "hnd,hmd->hnm"}> : () -> ()
    %cst_16 = arith.constant dense<0.000000e+00> : vector<4x64x64xf32>
    %60 = tpu.matmul %41, %50, %cst_16 {dimension_numbers = #tpu.dot_dimension_numbers<[2], [2], [1], [1], [0, 0, 0, 1, 1, 1], [0], [0]>} : vector<4x64x8xf32>, vector<4x64x8xf32>, vector<4x64x64xf32> -> vector<4x64x64xf32>
    "tpu.trace_stop"() : () -> ()
    %c0_17 = arith.constant 0 : index
    %c0_18 = arith.constant 0 : index
    %c0_19 = arith.constant 0 : index
    %61 = vector.load %arg2[%c0_17, %c0_18, %c0_19] : memref<4x64x64xf32, #tpu.memory_space<vmem>>, vector<4x64x64xf32>
    %62 = arith.addf %60, %61 : vector<4x64x64xf32>
    %cst_20 = arith.constant dense<0xFF800000> : vector<4x64xf32>
    %63 = vector.multi_reduction <maximumf>, %62, %cst_20 [2] : vector<4x64x64xf32> to vector<4x64xf32>
    %64 = vector.shape_cast %63 : vector<4x64xf32> to vector<4x64x1xf32>
    %65 = vector.broadcast %64 : vector<4x64x1xf32> to vector<4x64x64xf32>
    %66 = arith.subf %62, %65 : vector<4x64x64xf32>
    %67 = math.exp %66 : vector<4x64x64xf32>
    %cst_21 = arith.constant dense<0.000000e+00> : vector<4x64xf32>
    %68 = vector.multi_reduction <add>, %67, %cst_21 [2] : vector<4x64x64xf32> to vector<4x64xf32>
    %69 = vector.shape_cast %68 : vector<4x64xf32> to vector<4x64x1xf32>
    %70 = vector.broadcast %69 : vector<4x64x1xf32> to vector<4x64x64xf32>
    %71 = arith.divf %67, %70 : vector<4x64x64xf32>
    "tpu.trace_start"() <{level = 10 : i32, message = "hnm,hmd->hnd"}> : () -> ()
    %cst_22 = arith.constant dense<0.000000e+00> : vector<4x64x8xf32>
    %72 = tpu.matmul %71, %59, %cst_22 {dimension_numbers = #tpu.dot_dimension_numbers<[2], [1], [1], [2], [0, 0, 0, 1, 1, 2], [0], [0]>} : vector<4x64x64xf32>, vector<4x64x8xf32>, vector<4x64x8xf32> -> vector<4x64x8xf32>
    "tpu.trace_stop"() : () -> ()
    %73 = vector.extract_strided_slice %72 {offsets = [0, 0, 0], sizes = [1, 64, 8], strides = [1, 1, 1]} : vector<4x64x8xf32> to vector<1x64x8xf32>
    %74 = vector.shape_cast %73 : vector<1x64x8xf32> to vector<64x8xf32>
    %75 = vector.extract_strided_slice %72 {offsets = [1, 0, 0], sizes = [1, 64, 8], strides = [1, 1, 1]} : vector<4x64x8xf32> to vector<1x64x8xf32>
    %76 = vector.shape_cast %75 : vector<1x64x8xf32> to vector<64x8xf32>
    %77 = vector.extract_strided_slice %72 {offsets = [2, 0, 0], sizes = [1, 64, 8], strides = [1, 1, 1]} : vector<4x64x8xf32> to vector<1x64x8xf32>
    %78 = vector.shape_cast %77 : vector<1x64x8xf32> to vector<64x8xf32>
    %79 = vector.extract_strided_slice %72 {offsets = [3, 0, 0], sizes = [1, 64, 8], strides = [1, 1, 1]} : vector<4x64x8xf32> to vector<1x64x8xf32>
    %80 = vector.shape_cast %79 : vector<1x64x8xf32> to vector<64x8xf32>
    %81 = tpu.concatenate %74, %76, %78, %80 in 1 : vector<64x8xf32>, vector<64x8xf32>, vector<64x8xf32>, vector<64x8xf32> -> vector<64x32xf32>
    %c0_23 = arith.constant 0 : index
    %c0_24 = arith.constant 0 : index
    %82 = vector.load %arg7[%c0_23, %c0_24] : memref<32x32xf32, #tpu.memory_space<vmem>>, vector<32x32xf32>
    %cst_25 = arith.constant dense<0.000000e+00> : vector<64x32xf32>
    %83 = tpu.matmul %81, %82, %cst_25 {dimension_numbers = #tpu.dot_dimension_numbers<[1], [0], [0], [1], [0, 0, 1, 1], [], []>} : vector<64x32xf32>, vector<32x32xf32>, vector<64x32xf32> -> vector<64x32xf32>
    %c0_26 = arith.constant 0 : index
    %c0_27 = arith.constant 0 : index
    %84 = vector.load %arg8[%c0_26, %c0_27] : memref<1x32xf32, #tpu.memory_space<vmem>>, vector<1x32xf32>
    %85 = vector.broadcast %84 : vector<1x32xf32> to vector<64x32xf32>
    %86 = arith.addf %83, %85 : vector<64x32xf32>
    %87 = arith.addf %1, %86 : vector<64x32xf32>
    %cst_28 = arith.constant dense<0.000000e+00> : vector<64xf32>
    %88 = vector.multi_reduction <add>, %87, %cst_28 [1] : vector<64x32xf32> to vector<64xf32>
    %89 = vector.shape_cast %88 : vector<64xf32> to vector<64x1xf32>
    %cst_29 = arith.constant 3.200000e+01 : f32
    %90 = vector.broadcast %cst_29 : f32 to vector<64x1xf32>
    %91 = arith.divf %89, %90 : vector<64x1xf32>
    %92 = vector.broadcast %91 : vector<64x1xf32> to vector<64x32xf32>
    %93 = arith.subf %87, %92 : vector<64x32xf32>
    %94 = arith.mulf %93, %93 : vector<64x32xf32>
    %cst_30 = arith.constant dense<0.000000e+00> : vector<64xf32>
    %95 = vector.multi_reduction <add>, %94, %cst_30 [1] : vector<64x32xf32> to vector<64xf32>
    %96 = vector.shape_cast %95 : vector<64xf32> to vector<64x1xf32>
    %cst_31 = arith.constant 3.200000e+01 : f32
    %97 = vector.broadcast %cst_31 : f32 to vector<64x1xf32>
    %98 = arith.divf %96, %97 : vector<64x1xf32>
    %99 = vector.broadcast %91 : vector<64x1xf32> to vector<64x32xf32>
    %100 = arith.subf %87, %99 : vector<64x32xf32>
    %cst_32 = arith.constant 9.99999974E-6 : f32
    %101 = vector.broadcast %cst_32 : f32 to vector<64x1xf32>
    %102 = arith.addf %98, %101 : vector<64x1xf32>
    %103 = math.rsqrt %102 : vector<64x1xf32>
    %104 = vector.broadcast %103 : vector<64x1xf32> to vector<64x32xf32>
    %105 = arith.mulf %100, %104 : vector<64x32xf32>
    %c0_33 = arith.constant 0 : index
    %c0_34 = arith.constant 0 : index
    %106 = vector.load %arg9[%c0_33, %c0_34] : memref<1x32xf32, #tpu.memory_space<vmem>>, vector<1x32xf32>
    %107 = vector.broadcast %106 : vector<1x32xf32> to vector<64x32xf32>
    %108 = arith.mulf %105, %107 : vector<64x32xf32>
    %c0_35 = arith.constant 0 : index
    %c0_36 = arith.constant 0 : index
    %109 = vector.load %arg10[%c0_35, %c0_36] : memref<1x32xf32, #tpu.memory_space<vmem>>, vector<1x32xf32>
    %110 = vector.broadcast %109 : vector<1x32xf32> to vector<64x32xf32>
    %111 = arith.addf %108, %110 : vector<64x32xf32>
    %c0_37 = arith.constant 0 : index
    %c0_38 = arith.constant 0 : index
    %112 = vector.load %arg11[%c0_37, %c0_38] : memref<32x128xf32, #tpu.memory_space<vmem>>, vector<32x128xf32>
    %cst_39 = arith.constant dense<0.000000e+00> : vector<64x128xf32>
    %113 = tpu.matmul %111, %112, %cst_39 {dimension_numbers = #tpu.dot_dimension_numbers<[1], [0], [0], [1], [0, 0, 1, 1], [], []>} : vector<64x32xf32>, vector<32x128xf32>, vector<64x128xf32> -> vector<64x128xf32>
    %c0_40 = arith.constant 0 : index
    %c0_41 = arith.constant 0 : index
    %114 = vector.load %arg12[%c0_40, %c0_41] : memref<1x128xf32, #tpu.memory_space<vmem>>, vector<1x128xf32>
    %115 = vector.broadcast %114 : vector<1x128xf32> to vector<64x128xf32>
    %116 = arith.addf %113, %115 : vector<64x128xf32>
    %cst_42 = arith.constant 5.000000e-01 : f32
    %117 = vector.broadcast %cst_42 : f32 to vector<64x128xf32>
    %118 = arith.mulf %117, %116 : vector<64x128xf32>
    %119 = arith.mulf %116, %116 : vector<64x128xf32>
    %120 = arith.mulf %116, %119 : vector<64x128xf32>
    %cst_43 = arith.constant 4.471500e-02 : f32
    %121 = vector.broadcast %cst_43 : f32 to vector<64x128xf32>
    %122 = arith.mulf %121, %120 : vector<64x128xf32>
    %123 = arith.addf %116, %122 : vector<64x128xf32>
    %cst_44 = arith.constant 0.797884583 : f32
    %124 = vector.broadcast %cst_44 : f32 to vector<64x128xf32>
    %125 = arith.mulf %124, %123 : vector<64x128xf32>
    %126 = math.tanh %125 : vector<64x128xf32>
    %cst_45 = arith.constant 1.000000e+00 : f32
    %127 = vector.broadcast %cst_45 : f32 to vector<64x128xf32>
    %128 = arith.addf %127, %126 : vector<64x128xf32>
    %129 = arith.mulf %118, %128 : vector<64x128xf32>
    %c0_46 = arith.constant 0 : index
    %c0_47 = arith.constant 0 : index
    %130 = vector.load %arg13[%c0_46, %c0_47] : memref<128x32xf32, #tpu.memory_space<vmem>>, vector<128x32xf32>
    %cst_48 = arith.constant dense<0.000000e+00> : vector<64x32xf32>
    %131 = tpu.matmul %129, %130, %cst_48 {dimension_numbers = #tpu.dot_dimension_numbers<[1], [0], [0], [1], [0, 0, 1, 1], [], []>} : vector<64x128xf32>, vector<128x32xf32>, vector<64x32xf32> -> vector<64x32xf32>
    %c0_49 = arith.constant 0 : index
    %c0_50 = arith.constant 0 : index
    %132 = vector.load %arg14[%c0_49, %c0_50] : memref<1x32xf32, #tpu.memory_space<vmem>>, vector<1x32xf32>
    %133 = vector.broadcast %132 : vector<1x32xf32> to vector<64x32xf32>
    %134 = arith.addf %131, %133 : vector<64x32xf32>
    %135 = arith.addf %87, %134 : vector<64x32xf32>
    %c0_51 = arith.constant 0 : index
    %c0_52 = arith.constant 0 : index
    %c0_53 = arith.constant 0 : index
    %136 = vector.load %arg15[%c0_51, %c0_52, %c0_53] : memref<1x64x32xf32, #tpu.memory_space<vmem>>, vector<1x64x32xf32>
    %137 = vector.shape_cast %136 : vector<1x64x32xf32> to vector<64x32xf32>
    %138 = vector.shape_cast %135 : vector<64x32xf32> to vector<1x64x32xf32>
    tpu.vector_store %arg15[%c0_51, %c0_52, %c0_53], %138 {strides = array<i32>} : memref<1x64x32xf32, #tpu.memory_space<vmem>>, vector<1x64x32xf32>,
    return
  }
  func.func @transform_0(%arg0: i32) -> (i32, i32, i32) {
    %c0_i32 = arith.constant 0 : i32
    %c0_i32_0 = arith.constant 0 : i32
    %c0_i32_1 = arith.constant 0 : i32
    return %arg0, %c0_i32, %c0_i32_0 : i32, i32, i32
  }
  func.func @transform_1(%arg0: i32) -> (i32, i32, i32) {
    %c0_i32 = arith.constant 0 : i32
    %c0_i32_0 = arith.constant 0 : i32
    %c0_i32_1 = arith.constant 0 : i32
    %c0_i32_2 = arith.constant 0 : i32
    return %c0_i32, %c0_i32_0, %c0_i32_1 : i32, i32, i32
  }
  func.func @transform_2(%arg0: i32) -> (i32, i32) {
    %c0_i32 = arith.constant 0 : i32
    %c0_i32_0 = arith.constant 0 : i32
    %c0_i32_1 = arith.constant 0 : i32
    return %c0_i32, %c0_i32_0 : i32, i32
  }
  func.func @transform_3(%arg0: i32) -> (i32, i32) {
    %c0_i32 = arith.constant 0 : i32
    %c0_i32_0 = arith.constant 0 : i32
    %c0_i32_1 = arith.constant 0 : i32
    return %c0_i32, %c0_i32_0 : i32, i32
  }
  func.func @transform_4(%arg0: i32) -> (i32, i32) {
    %c0_i32 = arith.constant 0 : i32
    %c0_i32_0 = arith.constant 0 : i32
    %c0_i32_1 = arith.constant 0 : i32
    return %c0_i32, %c0_i32_0 : i32, i32
  }
  func.func @transform_5(%arg0: i32) -> (i32, i32) {
    %c0_i32 = arith.constant 0 : i32
    %c0_i32_0 = arith.constant 0 : i32
    %c0_i32_1 = arith.constant 0 : i32
    return %c0_i32, %c0_i32_0 : i32, i32
  }
  func.func @transform_6(%arg0: i32) -> (i32, i32) {
    %c0_i32 = arith.constant 0 : i32
    %c0_i32_0 = arith.constant 0 : i32
    %c0_i32_1 = arith.constant 0 : i32
    return %c0_i32, %c0_i32_0 : i32, i32
  }
  func.func @transform_7(%arg0: i32) -> (i32, i32) {
    %c0_i32 = arith.constant 0 : i32
    %c0_i32_0 = arith.constant 0 : i32
    %c0_i32_1 = arith.constant 0 : i32
    return %c0_i32, %c0_i32_0 : i32, i32
  }
  func.func @transform_8(%arg0: i32) -> (i32, i32) {
    %c0_i32 = arith.constant 0 : i32
    %c0_i32_0 = arith.constant 0 : i32
    %c0_i32_1 = arith.constant 0 : i32
    return %c0_i32, %c0_i32_0 : i32, i32
  }
  func.func @transform_9(%arg0: i32) -> (i32, i32) {
    %c0_i32 = arith.constant 0 : i32
    %c0_i32_0 = arith.constant 0 : i32
    %c0_i32_1 = arith.constant 0 : i32
    return %c0_i32, %c0_i32_0 : i32, i32
  }
  func.func @transform_10(%arg0: i32) -> (i32, i32) {
    %c0_i32 = arith.constant 0 : i32
    %c0_i32_0 = arith.constant 0 : i32
    %c0_i32_1 = arith.constant 0 : i32
    return %c0_i32, %c0_i32_0 : i32, i32
  }
  func.func @transform_11(%arg0: i32) -> (i32, i32) {
    %c0_i32 = arith.constant 0 : i32
    %c0_i32_0 = arith.constant 0 : i32
    %c0_i32_1 = arith.constant 0 : i32
    return %c0_i32, %c0_i32_0 : i32, i32
  }
  func.func @transform_12(%arg0: i32) -> (i32, i32) {
    %c0_i32 = arith.constant 0 : i32
    %c0_i32_0 = arith.constant 0 : i32
    %c0_i32_1 = arith.constant 0 : i32
    return %c0_i32, %c0_i32_0 : i32, i32
  }
  func.func @transform_13(%arg0: i32) -> (i32, i32) {
    %c0_i32 = arith.constant 0 : i32
    %c0_i32_0 = arith.constant 0 : i32
    %c0_i32_1 = arith.constant 0 : i32
    return %c0_i32, %c0_i32_0 : i32, i32
  }
  func.func @transform_14(%arg0: i32) -> (i32, i32, i32) {
    %c0_i32 = arith.constant 0 : i32
    %c0_i32_0 = arith.constant 0 : i32
    %c0_i32_1 = arith.constant 0 : i32
    return %arg0, %c0_i32, %c0_i32_0 : i32, i32, i32
  }
}

</mosaic_0001>

<bundles_post_ra>
// kernel: _lambda_.1
= control target key start
LH: loop header
LB: loop body
LE: loop exit
PB: predicated region body
PF: predicated region fallthrough
CT: control target
= control target key end

     0   :  { %19 = vsyncpa [#allocation3], 0  ;;  %s4722_s29 = smov 0   ;;  %s5897_s0 = inlined_call_operand.vmem [shape: f32[2,64,32], index: 0, kind: input, shape index: {}]   ;;  %s5898_s1 = inlined_call_operand.hbm [shape: f32[4,64,64], index: 1, kind: input, shape index: {}]   ;;  %s5899_s2 = inlined_call_operand.vmem [shape: f32[1,32], index: 2, kind: input, shape index: {}]   ;;  %s5900_s3 = inlined_call_operand.vmem [shape: f32[1,32], index: 3, kind: input, shape index: {}]   ;;  %s5901_s4 = inlined_call_operand.vmem [shape: f32[32,96], index: 4, kind: input, shape index: {}]   ;;  %s5902_s5 = inlined_call_operand.vmem [shape: f32[1,96], index: 5, kind: input, shape index: {}]   ;;  %s5903_s6 = inlined_call_operand.vmem [shape: f32[32,32], index: 6, kind: input, shape index: {}]   ;;  %s5904_s7 = inlined_call_operand.vmem [shape: f32[1,32], index: 7, kind: input, shape index: {}]   ;;  %s5905_s8 = inlined_call_operand.vmem [shape: f32[1,32], index: 8, kind: input, shape index: {}]   ;;  %s5906_s9 = inlined_call_operand.vmem [shape: f32[1,32], index: 9, kind: input, shape index: {}]   ;;  %s5907_s10 = inlined_call_operand.vmem [shape: f32[32,128], index: 10, kind: input, shape index: {}]   ;;  %s5908_s11 = inlined_call_operand.vmem [shape: f32[1,128], index: 11, kind: input, shape index: {}]   ;;  %s5909_s12 = inlined_call_operand.vmem [shape: f32[128,32], index: 12, kind: input, shape index: {}]   ;;  %s5910_s13 = inlined_call_operand.vmem [shape: f32[1,32], index: 13, kind: input, shape index: {}]   ;;  %s5911_s14 = inlined_call_operand.vmem [shape: f32[2,64,32], index: 14, kind: output, shape index: {}]  }
   0x1 LB: > { %s4728_s30 = sadd.s32 4294967295, %s4634_s29   ;;  %p3350_p0 = scmp.ge.s32.totalorder %s4634_s29, 1  ;;  %s4634_s29 = sphi %s4722_s29, %s25_s29  }
   0x2   : > { %p355_p1 = scmp.lt.s32.totalorder %s4634_s29, 3  ;;  %s4636_s15 = smov [#allocation2]  }
   0x3   : > { %s367_s16 = sshll.u32 %s4636_s15, 4  ;;  %p5912_p3 = scmp.eq.s32.totalorder %s4728_s30, 0  ;;  %s368_s16 = int_to_ptr.vmem [resolvable:$true] %s367_s16 }
   0x4   : > { %p4732_p2 = pnand %p3350_p0, %p355_p1  ;;  %s4596_s21 = scalar_lea.hbm %s5898_s1, 4096 }
   0x5   : > { %p4597_p6 = scmp.ne.s32.totalorder %s5898_s1, %s4596_s21  ;;  %p4603_p10 = scmp.lt.u32.totalorder %s4596_s21, %s5898_s1 }
   0x6   : > { %s5914_s17 = scalar_select %p4732_p2, 1, 0 }
   0x7   : > { %p4227_p4 = pneg %p4732_p2 }
   0x9   : > { %p4741_p5 = pnand %p5912_p3, %p4227_p4 }
   0xb   : > { %p4598_p7 = pneg %p4741_p5 }
   0xd   : > { %p4599_p8 = pnand %p4598_p7, %p4597_p6 }
   0xf   : > { %p4600_p9 = pneg %p4599_p8 }
  0x11   : > { %p4605_p11 = pnand %p4603_p10, %p4600_p9 }
  0x13   : > { %4608 = shalt.err (!%p4605_p11)
}
  0x14   : > { %s4609_s26 = scalar_lea.vmem %s368_s16, 4096  ;;  %p4617_p1 = scmp.lt.s32.totalorder %s368_s16, %s368_s16 }
  0x15   : > { %p4610_p12 = scmp.ne.s32.totalorder %s368_s16, %s4609_s26  ;;  %p4618_p4 = scmp.lt.s32.totalorder %s4609_s26, %s4609_s26 }
  0x17   : > { %p4612_p13 = pnand %p4610_p12, %p4598_p7  ;;  %p4619_p3 = por %p4618_p4, %p4617_p1 }
  0x19   : > { %p4613_p0 = pneg %p4612_p13 }
  0x1b   : > { %p4620_p2 = pnand %p4619_p3, %p4613_p0 }
  0x1d   : > { %4623 = shalt.err (!%p4620_p2)
}
  0x1e   : > { %s4637_s27 = smov 128   ;;  %s4638_s28 = smov 8  }
  0x1f   : > { %4230 = dma.hbm_to_vmem [thread:$0]  (!%p4741_p5), %s5898_s1, 4096, %s368_s16, [#allocation3], %s4637_s27, %s4637_s27, %s4638_s28  }
  0x20   : > { %p5916_p6 = scmp.ne.s32.totalorder %s5914_s17, 0 }
  0x21   : > { %p5917_p8 = scmp.eq.s32.totalorder (!%p5916_p6), %s4728_s30, 0 }
  0x22   : > { %427 = sbr.rel (%p5916_p6) target bundleno = 2829 (0xb0d), region = 76 }
  0x29   : > { %4629 = dma.done.wait (%p5917_p8), [#allocation3], 4096   ;;  %p5918_p7 = pmov %p5917_p8 }
  0x2a   : > { %p473_p2 = scmp.lt.s32.totalorder %s4728_s30, 1  ;;  %vm491_vm0 = vcmask 261120   ;;  %v627_v56 = vld [vmem:[%s5901_s4] sm:$0xff]  ;;  %v628_v57 = vld [vmem:[%s5901_s4 + $0x8] sm:$0xff]  ;;  %v629_v59 = vld [vmem:[%s5901_s4 + $0x10] sm:$0xff]  ;;  %s4639_s23 = smov 120  }
  0x2b   : > { %4631 = vsyncadd (%p5918_p7), [#allocation3], 4294963200  ;;  %v4007_v58 = vpack.c.bf16 %v628_v57, %v627_v56  ;;  %v630_v60 = vld [vmem:[%s5901_s4 + $0x18] sm:$0xff]  ;;  %vm927_vm1 = vcmask 64512   ;;  %s4640_s24 = smov 112   ;;  %s4641_s25 = smov 104  }
  0x2c   : > { %s5922_s30 = smov (!%p473_p2, %s4728_s30), 1  ;;  %v4011_v61 = vpack.c.bf16 %v630_v60, %v629_v59  ;;  %s4642_s26 = smov 96   ;;  %vm5038_vm2 = vmpackc.low %vm927_vm1, %vm927_vm1  ;;  %vm1556_vm3 = vcmask 523264   ;;  %vm2625_vm4 = vcmask 130048   ;;  %vm2634_vm5 = vcmask 195584  }
  0x2d   : > { %s3489_s18 = sshll.u32 %s5922_s30, 6  ;;  %4008 = vmatprep.subr.bf16.mxu0 %v4007_v58  ;;  %s4643_s27 = smov 64  }
  0x2e   : > { %s4777_s17 = scalar_lea.vmem %s5897_s0, %s3489_s18  ;;  %4010 = vmatpush3.bf16.msra.mxu0 %v4007_v58  ;;  %s4644_s28 = smov 8  }
  0x2f   : > { %v483_v0 = vld [vmem:[%s4777_s17] sm:$0xff]  ;;  %v485_v1 = vld [vmem:[%s4777_s17 + $0x10] sm:$0xff]  ;;  %v484_v2 = vld [vmem:[%s4777_s17 + $0x8] sm:$0xff]  ;;  %4012 = vmatprep.subr.bf16.mxu0 %v4011_v61  ;;  %s4645_s15 = smov 16  }
  0x30   : > { %v492_v3 = vsel %vm491_vm0, %v483_v0, 0.0  ;;  %v498_v4 = vsel %vm491_vm0, %v485_v1, 0.0  ;;  %v486_v5 = vld [vmem:[%s4777_s17 + $0x18] sm:$0xff]  ;;  %v495_v6 = vsel %vm491_vm0, %v484_v2, 0.0  ;;  %v487_v8 = vld [vmem:[%s4777_s17 + $0x20] sm:$0xff]  ;;  %v488_v9 = vld [vmem:[%s4777_s17 + $0x28] sm:$0xff] }
  0x31   : > { %493 = vadd.xlane.f32.xlu0 %v492_v3  ;;  %499 = vadd.xlane.f32.xlu1 %v498_v4  ;;  %v501_v7 = vsel %vm491_vm0, %v486_v5, 0.0  ;;  %v504_v10 = vsel %vm491_vm0, %v487_v8, 0.0  ;;  %v507_v11 = vsel %vm491_vm0, %v488_v9, 0.0  ;;  %v489_v12 = vld [vmem:[%s4777_s17 + $0x30] sm:$0xff]  ;;  %v490_v13 = vld [vmem:[%s4777_s17 + $0x38] sm:$0xff] }
  0x32   : > { %v510_v14 = vsel %vm491_vm0, %v489_v12, 0.0  ;;  %v513_v15 = vsel %vm491_vm0, %v490_v13, 0.0  ;;  %4014 = vmatpush3.bf16.msra.mxu0 %v4011_v61 }
  0x35   : > { %496 = vadd.xlane.f32.xlu0 %v495_v6  ;;  %502 = vadd.xlane.f32.xlu1 %v501_v7 }
  0x39   : > { %505 = vadd.xlane.f32.xlu0 %v504_v10  ;;  %508 = vadd.xlane.f32.xlu1 %v507_v11 }
  0x3d   : > { %511 = vadd.xlane.f32.xlu0 %v510_v14  ;;  %514 = vadd.xlane.f32.xlu1 %v513_v15 }
  0xbe   : > { %v494_v16 = vpop.xlane.xlu0 %493  ;;  %v500_v17 = vpop.xlane.xlu1 %499 }
  0xbf   : > { %v517_v18 = vmul.f32 0.03125, %v494_v16  ;;  %v519_v19 = vmul.f32 0.03125, %v500_v17 }
  0xc1   : > { %v4795_v20 = vsub.f32 %v483_v0, %v517_v18  ;;  %v4797_v21 = vsub.f32 %v485_v1, %v519_v19 }
  0xc2   : > { %v497_v22 = vpop.xlane.xlu0 %496  ;;  %v503_v23 = vpop.xlane.xlu1 %502 }
  0xc3   : > { %v518_v24 = vmul.f32 0.03125, %v497_v22  ;;  %v520_v25 = vmul.f32 0.03125, %v503_v23  ;;  %v533_v26 = vmul.f32 %v4795_v20, %v4795_v20  ;;  %v535_v27 = vmul.f32 %v4797_v21, %v4797_v21  ;;  %v3359_v22 = vld [vmem:[%s5899_s2] ss:$0 sm:$0xff] }
  0xc5   : > { %v4803_v28 = vsub.f32 %v484_v2, %v518_v24  ;;  %v4805_v29 = vsub.f32 %v486_v5, %v520_v25  ;;  %v541_v30 = vsel %vm491_vm0, %v533_v26, 0.0  ;;  %v547_v33 = vsel %vm491_vm0, %v535_v27, 0.0  ;;  %v3360_v26 = vld [vmem:[%s5900_s3] ss:$0 sm:$0xff] }
  0xc6   : > { %542 = vadd.xlane.f32.xlu0 %v541_v30  ;;  %v506_v31 = vpop.xlane.xlu0 %505  ;;  %v509_v32 = vpop.xlane.xlu1 %508 }
  0xc7   : > { %v521_v34 = vmul.f32 0.03125, %v506_v31  ;;  %v522_v35 = vmul.f32 0.03125, %v509_v32  ;;  %v534_v36 = vmul.f32 %v4803_v28, %v4803_v28  ;;  %v536_v37 = vmul.f32 %v4805_v29, %v4805_v29 }
  0xc9   : > { %v4813_v38 = vsub.f32 %v487_v8, %v521_v34  ;;  %v4815_v39 = vsub.f32 %v488_v9, %v522_v35  ;;  %v544_v40 = vsel %vm491_vm0, %v534_v36, 0.0  ;;  %v550_v43 = vsel %vm491_vm0, %v536_v37, 0.0 }
  0xca   : > { %548 = vadd.xlane.f32.xlu0 %v547_v33  ;;  %545 = vadd.xlane.f32.xlu1 %v544_v40  ;;  %v512_v41 = vpop.xlane.xlu0 %511  ;;  %v515_v42 = vpop.xlane.xlu1 %514 }
  0xcb   : > { %v523_v44 = vmul.f32 0.03125, %v512_v41  ;;  %v524_v45 = vmul.f32 0.03125, %v515_v42  ;;  %v537_v46 = vmul.f32 %v4813_v38, %v4813_v38  ;;  %v538_v47 = vmul.f32 %v4815_v39, %v4815_v39 }
  0xcd   : > { %v4823_v48 = vsub.f32 %v489_v12, %v523_v44  ;;  %v4825_v49 = vsub.f32 %v490_v13, %v524_v45  ;;  %v553_v50 = vsel %vm491_vm0, %v537_v46, 0.0  ;;  %v556_v51 = vsel %vm491_vm0, %v538_v47, 0.0 }
  0xce   : > { %551 = vadd.xlane.f32.xlu1 %v550_v43  ;;  %554 = vadd.xlane.f32.xlu0 %v553_v50 }
  0xcf   : > { %v539_v52 = vmul.f32 %v4823_v48, %v4823_v48  ;;  %v540_v53 = vmul.f32 %v4825_v49, %v4825_v49 }
  0xd1   : > { %v559_v54 = vsel %vm491_vm0, %v539_v52, 0.0  ;;  %v562_v55 = vsel %vm491_vm0, %v540_v53, 0.0 }
  0xd2   : > { %557 = vadd.xlane.f32.xlu1 %v556_v51  ;;  %560 = vadd.xlane.f32.xlu0 %v559_v54 }
  0xd6   : > { %563 = vadd.xlane.f32.xlu1 %v562_v55 }
 0x153   : > { %v543_v62 = vpop.xlane.xlu0 %542 }
 0x154   : > { %v565_v63 = vmul.f32 0.03125, %v543_v62 }
 0x156   : > { %v573_v0 = vadd.f32 1e-05, %v565_v63 }
 0x157   : > { %v546_v1 = vpop.xlane.xlu1 %545  ;;  %v549_v2 = vpop.xlane.xlu0 %548 }
 0x158   : > { %4412 = vrsqrt.f32 %v573_v0  ;;  %v566_v3 = vmul.f32 0.03125, %v546_v1  ;;  %v567_v4 = vmul.f32 0.03125, %v549_v2 }
 0x15a   : > { %v574_v5 = vadd.f32 1e-05, %v566_v3  ;;  %v575_v6 = vadd.f32 1e-05, %v567_v4 }
 0x15b   : > { %v552_v7 = vpop.xlane.xlu1 %551  ;;  %v555_v8 = vpop.xlane.xlu0 %554 }
 0x15c   : > { %4414 = vrsqrt.f32 %v574_v5  ;;  %v568_v9 = vmul.f32 0.03125, %v552_v7  ;;  %v569_v10 = vmul.f32 0.03125, %v555_v8 }
 0x15d   : > { %4416 = vrsqrt.f32 %v575_v6 }
 0x15e   : > { %v576_v11 = vadd.f32 1e-05, %v568_v9  ;;  %v577_v12 = vadd.f32 1e-05, %v569_v10 }
 0x15f   : > { %v558_v13 = vpop.xlane.xlu1 %557  ;;  %v561_v14 = vpop.xlane.xlu0 %560 }
 0x160   : > { %4418 = vrsqrt.f32 %v576_v11  ;;  %v570_v15 = vmul.f32 0.03125, %v558_v13  ;;  %v571_v16 = vmul.f32 0.03125, %v561_v14 }
 0x161   : > { %4420 = vrsqrt.f32 %v577_v12 }
 0x162   : > { %v4413_v17 = vpop.eup %4412  ;;  %v578_v18 = vadd.f32 1e-05, %v570_v15  ;;  %v579_v19 = vadd.f32 1e-05, %v571_v16 }
 0x163   : > { %v564_v23 = vpop.xlane.xlu1 %563  ;;  %v589_v24 = vmul.f32 %v4413_v17, %v4795_v20 }
 0x164   : > { %4422 = vrsqrt.f32 %v578_v18  ;;  %v572_v25 = vmul.f32 0.03125, %v564_v23 }
 0x165   : > { %4424 = vrsqrt.f32 %v579_v19  ;;  %v604_v27 = vmul.f32 %v3359_v22, %v589_v24 }
 0x166   : > { %v4415_v30 = vpop.eup %4414  ;;  %v580_v31 = vadd.f32 1e-05, %v572_v25 }
 0x167   : > { %v4417_v32 = vpop.eup %4416  ;;  %v619_v33 = vadd.f32 %v3360_v26, %v604_v27  ;;  %v590_v34 = vmul.f32 %v4415_v30, %v4803_v28 }
 0x168   : > { %4426 = vrsqrt.f32 %v580_v31  ;;  %v591_v35 = vmul.f32 %v4417_v32, %v4797_v21 }
 0x169   : > { %3687 = vmatprep.mubr.msk.f32.mxu0 %vm491_vm0, %v619_v33  ;;  %v605_v20 = vmul.f32 %v3359_v22, %v590_v34 }
 0x16a   : > { %v4419_v36 = vpop.eup %4418  ;;  %v606_v37 = vmul.f32 %v3359_v22, %v591_v35 }
 0x16b   : > { %v4421_v40 = vpop.eup %4420  ;;  %v620_v41 = vadd.f32 %v3360_v26, %v605_v20  ;;  %v592_v42 = vmul.f32 %v4419_v36, %v4805_v29 }
 0x16c   : > { %v621_v43 = vadd.f32 %v3360_v26, %v606_v37  ;;  %v593_v44 = vmul.f32 %v4421_v40, %v4813_v38 }
 0x16d   : > { %3688 = vmatmul.mubr.msk.f32.vlgmr.msra.gmra.mrb[0].mxu0 %vm491_vm0, %v620_v41  ;;  %v607_v45 = vmul.f32 %v3359_v22, %v592_v42 }
 0x16e   : > { %v4423_v46 = vpop.eup %4422  ;;  %3690 = vmatprep.mubr.msk.f32.mxu0 %vm491_vm0, %v621_v43  ;;  %v608_v28 = vmul.f32 %v3359_v22, %v593_v44 }
 0x16f   : > { %v4425_v21 = vpop.eup %4424  ;;  %v622_v47 = vadd.f32 %v3360_v26, %v607_v45  ;;  %v594_v50 = vmul.f32 %v4423_v46, %v4815_v39 }
 0x170   : > { %v623_v51 = vadd.f32 %v3360_v26, %v608_v28  ;;  %v595_v52 = vmul.f32 %v4425_v21, %v4823_v48  ;;  %v3361_v48 = vld [vmem:[%s5902_s5] ss:$0 sm:$0xff] }
 0x171   : > { %3691 = vmatmul.mubr.msk.f32.gmra.mrb[2].mxu0 %vm491_vm0, %v622_v47  ;;  %v609_v29 = vmul.f32 %v3359_v22, %v594_v50 }
 0x172   : > { %v4427_v53 = vpop.eup %4426  ;;  %3693 = vmatprep.mubr.msk.f32.mxu0 %vm491_vm0, %v623_v51  ;;  %v610_v38 = vmul.f32 %v3359_v22, %v595_v52 }
 0x173   : > { %v624_v54 = vadd.f32 %v3360_v26, %v609_v29  ;;  %v596_v55 = vmul.f32 %v4427_v53, %v4825_v49 }
 0x174   : > { %v625_v56 = vadd.f32 %v3360_v26, %v610_v38 }
 0x175   : > { %3694 = vmatmul.mubr.msk.f32.gmra.mrb[4].mxu0 %vm491_vm0, %v624_v54  ;;  %v611_v57 = vmul.f32 %v3359_v22, %v596_v55 }
 0x176   : > { %3696 = vmatprep.mubr.msk.f32.mxu0 %vm491_vm0, %v625_v56 }
 0x177   : > { %v626_v39 = vadd.f32 %v3360_v26, %v611_v57 }
 0x179   : > { %3697 = vmatmul.mubr.msk.f32.gmra.mrb[6].mxu0 %vm491_vm0, %v626_v39 }
 0x240   : > { %v3689_v58 = vpop.f32.mrb[0].mxu0 }
 0x241   : > { %v4872_v59 = vadd.f32 %v3689_v58, %v3361_v48  ;;  %v728_v60 = vpop.f32.mrb[1].mxu0 }
 0x242   : > { %v729_v61 = vadd.f32 %v3361_v48, %v728_v60 }
 0x243   : > { %777 = vrot.lane.b32.xlu1 %v4872_v59, %s4639_s23 }
 0x244   : > { %775 = vrot.lane.b32.xlu0 %v729_v61, %s4639_s23  ;;  %v3692_v49 = vpop.f32.mrb[2].mxu0  ;;  %v847_v62 = vmul.f32 0.35355338, %v729_v61  ;;  %v4876_v63 = vpack.i.bf16 %v4872_v59, %v729_v61 }
 0x245   : > { %v4878_v0 = vadd.f32 %v3692_v49, %v3361_v48  ;;  %v738_v1 = vpop.f32.mrb[3].mxu0 }
 0x246   : > { %v4880_v2 = vadd.f32 %v3361_v48, %v738_v1  ;;  %3715 = vmatprep.mubr.msk.f32.mxu1 %vm927_vm1, %v847_v62 }
 0x248   : > { %779 = vrot.lane.b32.xlu1 %v4880_v2, %s4639_s23  ;;  %v3695_v3 = vpop.f32.mrb[4].mxu0  ;;  %v4886_v4 = vpack.i.bf16 %v4878_v0, %v4880_v2 }
 0x249   : > { %v4888_v5 = vadd.f32 %v3695_v3, %v3361_v48  ;;  %v748_v6 = vpop.f32.mrb[5].mxu0 }
 0x24a   : > { %v4890_v7 = vadd.f32 %v3361_v48, %v748_v6 }
 0x24c   : > { %781 = vrot.lane.b32.xlu1 %v4878_v0, %s4639_s23  ;;  %783 = vrot.lane.b32.xlu0 %v4890_v7, %s4639_s23  ;;  %v3698_v8 = vpop.f32.mrb[6].mxu0  ;;  %v4896_v9 = vpack.i.bf16 %v4888_v5, %v4890_v7 }
 0x24d   : > { %v4898_v10 = vadd.f32 %v3698_v8, %v3361_v48  ;;  %v758_v11 = vpop.f32.mrb[7].mxu0 }
 0x24e   : > { %v4900_v12 = vadd.f32 %v3361_v48, %v758_v11  ;;  %v849_v11 = vmul.f32 0.35355338, %v4880_v2 }
 0x250   : > { %785 = vrot.lane.b32.xlu1 %v4888_v5, %s4639_s23  ;;  %787 = vrot.lane.b32.xlu0 %v4900_v12, %s4639_s23  ;;  %v4906_v13 = vpack.i.bf16 %v4898_v10, %v4900_v12 }
 0x254   : > { %789 = vrot.lane.b32.xlu1 %v4898_v10, %s4639_s23  ;;  %799 = vrot.lane.b32.xlu0 %v729_v61, %s4640_s24 }
 0x258   : > { %801 = vrot.lane.b32.xlu1 %v4872_v59, %s4640_s24  ;;  %823 = vrot.lane.b32.xlu0 %v729_v61, %s4641_s25 }
 0x25c   : > { %825 = vrot.lane.b32.xlu1 %v4872_v59, %s4641_s25  ;;  %803 = vrot.lane.b32.xlu0 %v4880_v2, %s4640_s24 }
 0x260   : > { %805 = vrot.lane.b32.xlu1 %v4878_v0, %s4640_s24  ;;  %827 = vrot.lane.b32.xlu0 %v4880_v2, %s4641_s25 }
 0x264   : > { %829 = vrot.lane.b32.xlu1 %v4878_v0, %s4641_s25  ;;  %807 = vrot.lane.b32.xlu0 %v4890_v7, %s4640_s24 }
 0x268   : > { %809 = vrot.lane.b32.xlu1 %v4888_v5, %s4640_s24  ;;  %831 = vrot.lane.b32.xlu0 %v4890_v7, %s4641_s25 }
 0x26c   : > { %833 = vrot.lane.b32.xlu1 %v4888_v5, %s4641_s25  ;;  %811 = vrot.lane.b32.xlu0 %v4900_v12, %s4640_s24 }
 0x270   : > { %813 = vrot.lane.b32.xlu1 %v4898_v10, %s4640_s24  ;;  %835 = vrot.lane.b32.xlu0 %v4900_v12, %s4641_s25 }
 0x274   : > { %837 = vrot.lane.b32.xlu1 %v4898_v10, %s4641_s25  ;;  %4253 = vrot.lane.b32.xlu0 %v4876_v63, %s4642_s26 }
 0x278   : > { %4263 = vrot.lane.b32.xlu0 %v4886_v4, %s4642_s26 }
 0x27c   : > { %4273 = vrot.lane.b32.xlu0 %v4896_v9, %s4642_s26 }
 0x280   : > { %4283 = vrot.lane.b32.xlu0 %v4906_v13, %s4642_s26 }
 0x2b5   : > { %v4931_v14 = vpop.permute.xlu1 %777 }
 0x2b6   : > { %v776_v15 = vpop.permute.xlu0 %775 }
 0x2b7   : > { %v855_v16 = vmul.f32 0.35355338, %v776_v15  ;;  %v4934_v17 = vpack.i.bf16 %v4931_v14, %v776_v15  ;;  %v851_v15 = vmul.f32 0.35355338, %v4890_v7 }
 0x2b9   : > { %3743 = vmatprep.mubr.msk.f32.mxu0 %vm927_vm1, %v855_v16  ;;  %4258 = vrot.lane.b32.xlu1 %v4934_v17, %s4642_s26  ;;  %v852_v16 = vmul.f32 0.35355338, %v4888_v5 }
 0x2ba   : > { %v4939_v18 = vpop.permute.xlu1 %779 }
 0x2be   : > { %v4941_v19 = vpop.permute.xlu1 %781  ;;  %v4943_v22 = vpop.permute.xlu0 %783 }
 0x2bf   : > { %v4947_v23 = vpack.i.bf16 %v4941_v19, %v4939_v18 }
 0x2c1   : > { %4268 = vrot.lane.b32.xlu1 %v4947_v23, %s4642_s26 }
 0x2c2   : > { %v4951_v24 = vpop.permute.xlu1 %785  ;;  %v4953_v25 = vpop.permute.xlu0 %787 }
 0x2c3   : > { %v4277_v26 = vpack.i.bf16 %v4951_v24, %v4943_v22 }
 0x2c5   : > { %4278 = vrot.lane.b32.xlu1 %v4277_v26, %s4642_s26 }
 0x2c6   : > { %v4958_v27 = vpop.permute.xlu1 %789  ;;  %v4960_v30 = vpop.permute.xlu0 %799 }
 0x2c7   : > { %v4964_v31 = vpack.i.bf16 %v4958_v27, %v4953_v25  ;;  %v863_v2 = vmul.f32 0.35355338, %v4960_v30 }
 0x2c9   : > { %4288 = vrot.lane.b32.xlu1 %v4964_v31, %s4642_s26 }
 0x2ca   : > { %v4968_v32 = vpop.permute.xlu1 %801  ;;  %v4970_v33 = vpop.permute.xlu0 %823 }
 0x2cb   : > { %v4292_v34 = vpack.i.bf16 %v4968_v32, %v4960_v30 }
 0x2cd   : > { %4293 = vrot.lane.b32.xlu0 %v4292_v34, %s4642_s26 }
 0x2ce   : > { %v4975_v35 = vpop.permute.xlu1 %825  ;;  %v4977_v20 = vpop.permute.xlu0 %803 }
 0x2cf   : > { %v4297_v36 = vpack.i.bf16 %v4975_v35, %v4970_v33  ;;  %v872_v57 = vmul.f32 0.35355338, %v4975_v35 }
 0x2d1   : > { %4298 = vrot.lane.b32.xlu1 %v4297_v36, %s4642_s26 }
 0x2d2   : > { %v4982_v37 = vpop.permute.xlu1 %805  ;;  %v4984_v40 = vpop.permute.xlu0 %827 }
 0x2d3   : > { %v4302_v41 = vpack.i.bf16 %v4982_v37, %v4977_v20 }
 0x2d5   : > { %4303 = vrot.lane.b32.xlu0 %v4302_v41, %s4642_s26 }
 0x2d6   : > { %v4989_v42 = vpop.permute.xlu1 %829  ;;  %v4991_v43 = vpop.permute.xlu0 %807 }
 0x2d7   : > { %v4307_v44 = vpack.i.bf16 %v4989_v42, %v4984_v40 }
 0x2d9   : > { %4308 = vrot.lane.b32.xlu1 %v4307_v44, %s4642_s26 }
 0x2da   : > { %v4996_v45 = vpop.permute.xlu1 %809  ;;  %v4998_v46 = vpop.permute.xlu0 %831 }
 0x2db   : > { %v5002_v28 = vpack.i.bf16 %v4996_v45, %v4991_v43  ;;  %v875_v35 = vmul.f32 0.35355338, %v4998_v46 }
 0x2dd   : > { %4313 = vrot.lane.b32.xlu0 %v5002_v28, %s4642_s26 }
 0x2de   : > { %v5006_v21 = vpop.permute.xlu1 %833  ;;  %v5008_v47 = vpop.permute.xlu0 %811 }
 0x2df   : > { %v5012_v50 = vpack.i.bf16 %v5006_v21, %v4998_v46 }
 0x2e1   : > { %4318 = vrot.lane.b32.xlu1 %v5012_v50, %s4642_s26 }
 0x2e2   : > { %v5016_v51 = vpop.permute.xlu1 %813  ;;  %v5018_v52 = vpop.permute.xlu0 %835 }
 0x2e3   : > { %v5022_v29 = vpack.i.bf16 %v5016_v51, %v5008_v47 }
 0x2e5   : > { %4323 = vrot.lane.b32.xlu0 %v5022_v29, %s4642_s26 }
 0x2e6   : > { %v5026_v53 = vpop.permute.xlu1 %837  ;;  %v4254_v38 = vpop.permute.xlu0 %4253 }
 0x2e7   : > { %v5030_v54 = vpack.i.bf16 %v5026_v53, %v5018_v52  ;;  %v4256_v55 = vunpack.i.h.bf16 %v4254_v38  ;;  %v4255_v56 = vunpack.i.l.bf16 %v4254_v38 }
 0x2e9   : > { %4333 = vrot.lane.b32.xlu0 %v4876_v63, %s4643_s27  ;;  %4328 = vrot.lane.b32.xlu1 %v5030_v54, %s4642_s26  ;;  %v4015_v48 = vpack.c.bf16 %v4256_v55, %v4255_v56  ;;  %s4646_s26 = smov 24  }
 0x2ea   : > { %v4264_v39 = vpop.permute.xlu0 %4263 }
 0x2eb   : > { %v4266_v58 = vunpack.i.h.bf16 %v4264_v39  ;;  %v4265_v60 = vunpack.i.l.bf16 %v4264_v39  ;;  %4017 = vmatprep.subr.msk.bf16.mxu1 %vm5038_vm2, %v4015_v48 }
 0x2ec   : > { %4020 = vmatpush3.bf16.xpose.msk.msra.mxu1 %vm5038_vm2, %v4015_v48 }
 0x2ed   : > { %v4021_v61 = vpack.c.bf16 %v4266_v58, %v4265_v60  ;;  %4343 = vrot.lane.b32.xlu0 %v4896_v9, %s4643_s27  ;;  %4338 = vrot.lane.b32.xlu1 %v4886_v4, %s4643_s27  ;;  %v848_v9 = vmul.f32 0.35355338, %v4872_v59  ;;  %v854_v59 = vmul.f32 0.35355338, %v4898_v10 }
 0x2ee   : > { %v4274_v49 = vpop.permute.xlu0 %4273 }
 0x2ef   : > { %4023 = vmatprep.subr.msk.bf16.mxu1 %vm5038_vm2, %v4021_v61  ;;  %v4276_v62 = vunpack.i.h.bf16 %v4274_v49  ;;  %v4275_v63 = vunpack.i.l.bf16 %v4274_v49 }
 0x2f1   : > { %4353 = vrot.lane.b32.xlu0 %v4934_v17, %s4643_s27  ;;  %4348 = vrot.lane.b32.xlu1 %v4906_v13, %s4643_s27  ;;  %v4027_v1 = vpack.c.bf16 %v4276_v62, %v4275_v63  ;;  %v850_v13 = vmul.f32 0.35355338, %v4878_v0  ;;  %v853_v17 = vmul.f32 0.35355338, %v4900_v12 }
 0x2f2   : > { %v4284_v3 = vpop.permute.xlu0 %4283 }
 0x2f3   : > { %v4286_v4 = vunpack.i.h.bf16 %v4284_v3  ;;  %v4285_v6 = vunpack.i.l.bf16 %v4284_v3 }
 0x2f4   : > { %4026 = vmatpush3.bf16.xpose.msk.msra.mxu1 %vm5038_vm2, %v4021_v61 }
 0x2f5   : > { %4358 = vrot.lane.b32.xlu0 %v4947_v23, %s4643_s27  ;;  %4363 = vrot.lane.b32.xlu1 %v4277_v26, %s4643_s27  ;;  %v4033_v8 = vpack.c.bf16 %v4286_v4, %v4285_v6 }
 0x2f6   : > { %4029 = vmatprep.subr.msk.bf16.mxu1 %vm5038_vm2, %v4027_v1 }
 0x2f9   : > { %4378 = vrot.lane.b32.xlu0 %v4302_v41, %s4643_s27  ;;  %4368 = vrot.lane.b32.xlu1 %v4292_v34, %s4643_s27 }
 0x2fc   : > { %4032 = vmatpush3.bf16.xpose.msk.msra.mxu1 %vm5038_vm2, %v4027_v1 }
 0x2fd   : > { %4383 = vrot.lane.b32.xlu0 %v4307_v44, %s4643_s27  ;;  %4373 = vrot.lane.b32.xlu1 %v4297_v36, %s4643_s27 }
 0x2fe   : > { %4035 = vmatprep.subr.msk.bf16.mxu1 %vm5038_vm2, %v4033_v8 }
 0x301   : > { %4388 = vrot.lane.b32.xlu0 %v4964_v31, %s4643_s27 }
 0x304   : > { %4038 = vmatpush3.bf16.xpose.msk.msra.mxu1 %vm5038_vm2, %v4033_v8 }
 0x30b   : > { %3716 = vmatmul.mubr.msk.f32.vlgmr.msra.gmra.mrb[0].mxu1 %vm927_vm1, %v848_v9 }
 0x30c   : > { %3718 = vmatprep.mubr.msk.f32.mxu1 %vm927_vm1, %v849_v11 }
 0x30f   : > { %3719 = vmatmul.mubr.msk.f32.gmra.mrb[2].mxu1 %vm927_vm1, %v850_v13  ;;  %v856_v13 = vmul.f32 0.35355338, %v4931_v14  ;;  %v859_v14 = vmul.f32 0.35355338, %v4943_v22 }
 0x310   : > { %3721 = vmatprep.mubr.msk.f32.mxu1 %vm927_vm1, %v851_v15  ;;  %v857_v15 = vmul.f32 0.35355338, %v4939_v18 }
 0x313   : > { %3722 = vmatmul.mubr.msk.f32.gmra.mrb[4].mxu1 %vm927_vm1, %v852_v16 }
 0x314   : > { %3724 = vmatprep.mubr.msk.f32.mxu1 %vm927_vm1, %v853_v17 }
 0x317   : > { %3725 = vmatmul.mubr.msk.f32.gmra.mrb[6].mxu1 %vm927_vm1, %v854_v59 }
 0x318   : > { %3771 = vmatprep.mubr.msk.f32.mxu1 %vm927_vm1, %v863_v2 }
 0x32b   : > { %v4259_v0 = vpop.permute.xlu1 %4258 }
 0x32c   : > { %v4261_v7 = vunpack.i.h.bf16 %v4259_v0  ;;  %v4260_v23 = vunpack.i.l.bf16 %v4259_v0  ;;  %v858_v0 = vmul.f32 0.35355338, %v4941_v19  ;;  %v860_v19 = vmul.f32 0.35355338, %v4951_v24 }
 0x32d   : > { %v871_v24 = vmul.f32 0.35355338, %v4970_v33  ;;  %v864_v33 = vmul.f32 0.35355338, %v4968_v32 }
 0x32e   : > { %v4039_v26 = vpack.c.bf16 %v4261_v7, %v4260_v23 }
 0x330   : > { %4041 = vmatprep.subr.msk.bf16.mxu0 %vm5038_vm2, %v4039_v26 }
 0x331   : > { %4044 = vmatpush3.bf16.xpose.msk.msra.mxu0 %vm5038_vm2, %v4039_v26 }
 0x333   : > { %v4269_v5 = vpop.permute.xlu1 %4268 }
 0x334   : > { %v4271_v12 = vunpack.i.h.bf16 %v4269_v5  ;;  %v4270_v31 = vunpack.i.l.bf16 %v4269_v5  ;;  %v861_v5 = vmul.f32 0.35355338, %v4953_v25 }
 0x336   : > { %v4045_v10 = vpack.c.bf16 %v4271_v12, %v4270_v31 }
 0x337   : > { %v4279_v34 = vpop.permute.xlu1 %4278 }
 0x338   : > { %v4281_v30 = vunpack.i.h.bf16 %v4279_v34  ;;  %v4280_v36 = vunpack.i.l.bf16 %v4279_v34  ;;  %4047 = vmatprep.subr.msk.bf16.mxu0 %vm5038_vm2, %v4045_v10  ;;  %v862_v34 = vmul.f32 0.35355338, %v4958_v27 }
 0x339   : > { %4050 = vmatpush3.bf16.xpose.msk.msra.mxu0 %vm5038_vm2, %v4045_v10 }
 0x33a   : > { %v4051_v41 = vpack.c.bf16 %v4281_v30, %v4280_v36 }
 0x33b   : > { %v4289_v44 = vpop.permute.xlu1 %4288 }
 0x33c   : > { %v4291_v38 = vunpack.i.h.bf16 %v4289_v44  ;;  %v4290_v55 = vunpack.i.l.bf16 %v4289_v44  ;;  %4053 = vmatprep.subr.msk.bf16.mxu0 %vm5038_vm2, %v4051_v41 }
 0x33e   : > { %v4057_v39 = vpack.c.bf16 %v4291_v38, %v4290_v55 }
 0x33f   : > { %v4294_v56 = vpop.permute.xlu0 %4293 }
 0x340   : > { %v4296_v48 = vunpack.i.h.bf16 %v4294_v56  ;;  %v4295_v58 = vunpack.i.l.bf16 %v4294_v56  ;;  %v865_v56 = vmul.f32 0.35355338, %v4977_v20 }
 0x341   : > { %4056 = vmatpush3.bf16.xpose.msk.msra.mxu0 %vm5038_vm2, %v4051_v41 }
 0x342   : > { %v4063_v60 = vpack.c.bf16 %v4296_v48, %v4295_v58  ;;  %4059 = vmatprep.subr.msk.bf16.mxu0 %vm5038_vm2, %v4057_v39 }
 0x343   : > { %v4299_v61 = vpop.permute.xlu1 %4298 }
 0x344   : > { %v4301_v49 = vunpack.i.h.bf16 %v4299_v61  ;;  %v4300_v62 = vunpack.i.l.bf16 %v4299_v61  ;;  %4065 = vmatprep.subr.msk.bf16.mxu1 %vm5038_vm2, %v4063_v60  ;;  %v866_v61 = vmul.f32 0.35355338, %v4982_v37 }
 0x345   : > { %4068 = vmatpush3.bf16.xpose.msk.msra.mxu1 %vm5038_vm2, %v4063_v60 }
 0x346   : > { %v4087_v1 = vpack.c.bf16 %v4301_v49, %v4300_v62  ;;  %v867_v49 = vmul.f32 0.35355338, %v4991_v43 }
 0x347   : > { %v4304_v63 = vpop.permute.xlu0 %4303 }
 0x348   : > { %v4306_v3 = vunpack.i.h.bf16 %v4304_v63  ;;  %v4305_v4 = vunpack.i.l.bf16 %v4304_v63  ;;  %v868_v63 = vmul.f32 0.35355338, %v4996_v45  ;;  %v873_v45 = vmul.f32 0.35355338, %v4984_v40 }
 0x349   : > { %4062 = vmatpush3.bf16.xpose.msk.msra.mxu0 %vm5038_vm2, %v4057_v39 }
 0x34a   : > { %v4069_v6 = vpack.c.bf16 %v4306_v3, %v4305_v4  ;;  %4089 = vmatprep.subr.msk.bf16.mxu0 %vm5038_vm2, %v4087_v1 }
 0x34b   : > { %v4309_v8 = vpop.permute.xlu1 %4308 }
 0x34c   : > { %v4311_v9 = vunpack.i.h.bf16 %v4309_v8  ;;  %v4310_v11 = vunpack.i.l.bf16 %v4309_v8  ;;  %4071 = vmatprep.subr.msk.bf16.mxu1 %vm5038_vm2, %v4069_v6 }
 0x34d   : > { %4074 = vmatpush3.bf16.xpose.msk.msra.mxu1 %vm5038_vm2, %v4069_v6 }
 0x34e   : > { %v4093_v17 = vpack.c.bf16 %v4311_v9, %v4310_v11 }
 0x34f   : > { %v4314_v16 = vpop.permute.xlu0 %4313 }
 0x350   : > { %v4316_v59 = vunpack.i.h.bf16 %v4314_v16  ;;  %v4315_v2 = vunpack.i.l.bf16 %v4314_v16  ;;  %3744 = vmatmul.mubr.msk.f32.vlgmr.msra.gmra.mrb[8].mxu0 %vm927_vm1, %v856_v13  ;;  %v870_v13 = vmul.f32 0.35355338, %v5016_v51 }
 0x351   : > { %3746 = vmatprep.mubr.msk.f32.mxu0 %vm927_vm1, %v857_v15  ;;  %4092 = vmatpush3.bf16.xpose.msk.msra.mxu0 %vm5038_vm2, %v4087_v1  ;;  %v869_v1 = vmul.f32 0.35355338, %v5008_v47 }
 0x352   : > { %v4075_v7 = vpack.c.bf16 %v4316_v59, %v4315_v2  ;;  %4095 = vmatprep.subr.msk.bf16.mxu0 %vm5038_vm2, %v4093_v17  ;;  %v874_v2 = vmul.f32 0.35355338, %v4989_v42 }
 0x353   : > { %v4319_v18 = vpop.permute.xlu1 %4318 }
 0x354   : > { %v4321_v23 = vunpack.i.h.bf16 %v4319_v18  ;;  %v4320_v26 = vunpack.i.l.bf16 %v4319_v18  ;;  %3747 = vmatmul.mubr.msk.f32.gmra.mrb[10].mxu0 %vm927_vm1, %v858_v0  ;;  %4077 = vmatprep.subr.msk.bf16.mxu1 %vm5038_vm2, %v4075_v7 }
 0x355   : > { %3749 = vmatprep.mubr.msk.f32.mxu0 %vm927_vm1, %v859_v14  ;;  %4080 = vmatpush3.bf16.xpose.msk.msra.mxu1 %vm5038_vm2, %v4075_v7  ;;  %v876_v7 = vmul.f32 0.35355338, %v5006_v21  ;;  %v877_v14 = vmul.f32 0.35355338, %v5018_v52  ;;  %v880_v52 = vld [vmem:[#allocation2 + $0x8] sm:$0xff] }
 0x356   : > { %v4099_v31 = vpack.c.bf16 %v4321_v23, %v4320_v26  ;;  %v878_v23 = vmul.f32 0.35355338, %v5026_v53  ;;  %v879_v26 = vld [vmem:[#allocation2] sm:$0xff] }
 0x357   : > { %v4324_v12 = vpop.permute.xlu0 %4323 }
 0x358   : > { %v4326_v22 = vunpack.i.h.bf16 %v4324_v12  ;;  %v4325_v10 = vunpack.i.l.bf16 %v4324_v12  ;;  %3750 = vmatmul.mubr.msk.f32.gmra.mrb[12].mxu0 %vm927_vm1, %v860_v19 }
 0x359   : > { %3752 = vmatprep.mubr.msk.f32.mxu0 %vm927_vm1, %v861_v5  ;;  %4098 = vmatpush3.bf16.xpose.msk.msra.mxu0 %vm5038_vm2, %v4093_v17 }
 0x35a   : > { %v4081_v30 = vpack.c.bf16 %v4326_v22, %v4325_v10  ;;  %4101 = vmatprep.subr.msk.bf16.mxu0 %vm5038_vm2, %v4099_v31  ;;  %v882_v22 = vld [vmem:[#allocation2 + $0x18] sm:$0xff] }
 0x35b   : > { %v4329_v25 = vpop.permute.xlu1 %4328  ;;  %v4334_v36 = vpop.permute.xlu0 %4333 }
 0x35c   : > { %v4331_v41 = vunpack.i.h.bf16 %v4329_v25  ;;  %v4330_v44 = vunpack.i.l.bf16 %v4329_v25  ;;  %3753 = vmatmul.mubr.msk.f32.gmra.mrb[14].mxu0 %vm927_vm1, %v862_v34  ;;  %4083 = vmatprep.subr.msk.bf16.mxu1 %vm5038_vm2, %v4081_v30  ;;  %v4336_v48 = vunpack.i.h.bf16 %v4334_v36  ;;  %v4335_v58 = vunpack.i.l.bf16 %v4334_v36  ;;  %v881_v25 = vld [vmem:[#allocation2 + $0x10] sm:$0xff]  ;;  %v884_v36 = vld [vmem:[#allocation2 + $0x28] sm:$0xff] }
 0x35d   : > { %4086 = vmatpush3.bf16.xpose.msk.msra.mxu1 %vm5038_vm2, %v4081_v30  ;;  %3799 = vmatprep.mubr.msk.f32.mxu0 %vm927_vm1, %v871_v24 }
 0x35e   : > { %v4105_v38 = vpack.c.bf16 %v4331_v41, %v4330_v44  ;;  %v4111_v20 = vpack.c.bf16 %v4336_v48, %v4335_v58 }
 0x35f   : > { %v4344_v27 = vpop.permute.xlu0 %4343  ;;  %v4339_v55 = vpop.permute.xlu1 %4338 }
 0x360   : > { %v4341_v3 = vunpack.i.h.bf16 %v4339_v55  ;;  %v4340_v43 = vunpack.i.l.bf16 %v4339_v55  ;;  %v4346_v47 = vunpack.i.h.bf16 %v4344_v27  ;;  %v4345_v16 = vunpack.i.l.bf16 %v4344_v27 }
 0x361   : > { %4104 = vmatpush3.bf16.xpose.msk.msra.mxu0 %vm5038_vm2, %v4099_v31 }
 0x362   : > { %4107 = vmatprep.subr.msk.bf16.mxu0 %vm5038_vm2, %v4105_v38  ;;  %v4115_v17 = vpack.c.bf16 %v4341_v3, %v4340_v43  ;;  %v4119_v0 = vpack.c.bf16 %v4346_v47, %v4345_v16  ;;  %v888_v43 = vld [vmem:[#allocation2 + $0x48] sm:$0xff] }
 0x363   : > { %v5155_v39 = vpop.permute.xlu0 %4353  ;;  %v4349_v60 = vpop.permute.xlu1 %4348 }
 0x364   : > { %3772 = vmatmul.mubr.msk.f32.vlgmr.msra.gmra.mrb[8].mxu1 %vm927_vm1, %v864_v33  ;;  %v4351_v40 = vunpack.i.h.bf16 %v4349_v60  ;;  %v4350_v51 = vunpack.i.l.bf16 %v4349_v60  ;;  %v4356_v42 = vunpack.i.h.bf16 %v5155_v39  ;;  %v4355_v46 = vunpack.i.l.bf16 %v5155_v39  ;;  %v883_v33 = vld [vmem:[#allocation2 + $0x20] sm:$0xff] }
 0x365   : > { %3774 = vmatprep.mubr.msk.f32.mxu1 %vm927_vm1, %v865_v56  ;;  %v886_v56 = vld [vmem:[#allocation2 + $0x38] sm:$0xff] }
 0x366   : > { %v4123_v18 = vpack.c.bf16 %v4351_v40, %v4350_v51  ;;  %v5191_v21 = vpack.c.bf16 %v4356_v42, %v4355_v46  ;;  %v890_v40 = vld [vmem:[#allocation2 + $0x58] sm:$0xff] }
 0x367   : > { %v5161_v62 = vpop.permute.xlu0 %4358  ;;  %v5163_v32 = vpop.permute.xlu1 %4363 }
 0x368   : > { %3775 = vmatmul.mubr.msk.f32.gmra.mrb[10].mxu1 %vm927_vm1, %v866_v61 }
 0x369   : > { %3777 = vmatprep.mubr.msk.f32.mxu1 %vm927_vm1, %v867_v49  ;;  %4110 = vmatpush3.bf16.xpose.msk.msra.mxu0 %vm5038_vm2, %v4105_v38 }
 0x36a   : > { %4112 = vmatprep.subr.bf16.mxu0 %v4111_v20 }
 0x36b   : > { %v4379_v37 = vpop.permute.xlu0 %4378  ;;  %v4369_v4 = vpop.permute.xlu1 %4368 }
 0x36c   : > { %3778 = vmatmul.mubr.msk.f32.gmra.mrb[12].mxu1 %vm927_vm1, %v868_v63  ;;  %v4371_v6 = vunpack.i.h.bf16 %v4369_v4  ;;  %v4370_v8 = vunpack.i.l.bf16 %v4369_v4  ;;  %v4381_v9 = vunpack.i.h.bf16 %v4379_v37  ;;  %v4380_v11 = vunpack.i.l.bf16 %v4379_v37  ;;  %v887_v4 = vld [vmem:[#allocation2 + $0x40] sm:$0xff] }
 0x36d   : > { %3780 = vmatprep.mubr.msk.f32.mxu1 %vm927_vm1, %v869_v1 }
 0x36e   : > { %v4143_v15 = vpack.c.bf16 %v4371_v6, %v4370_v8  ;;  %v4147_v59 = vpack.c.bf16 %v4381_v9, %v4380_v11 }
 0x370   : > { %3781 = vmatmul.mubr.msk.f32.gmra.mrb[14].mxu1 %vm927_vm1, %v870_v13  ;;  %3800 = vmatmul.mubr.msk.f32.vlgmr.msra.gmra.mrb[16].mxu0 %vm927_vm1, %v872_v57 }
 0x371   : > { %4144 = vmatprep.subr.bf16.mxu1 %v4143_v15  ;;  %3802 = vmatprep.mubr.msk.f32.mxu0 %vm927_vm1, %v873_v45 }
 0x372   : > { %4114 = vmatpush3.bf16.msra.mxu0 %v4111_v20  ;;  %4146 = vmatpush3.bf16.msra.mxu1 %v4143_v15  ;;  %v885_v20 = vld [vmem:[#allocation2 + $0x30] sm:$0xff] }
 0x373   : > { %4116 = vmatprep.subr.bf16.mxu0 %v4115_v17  ;;  %4148 = vmatprep.subr.bf16.mxu1 %v4147_v59 }
 0x374   : > { %3803 = vmatmul.mubr.msk.f32.gmra.mrb[18].mxu0 %vm927_vm1, %v874_v2  ;;  %v896_v2 = vld [vmem:[#allocation2 + $0x88] sm:$0xff] }
 0x375   : > { %3805 = vmatprep.mubr.msk.f32.mxu0 %vm927_vm1, %v875_v35  ;;  %v895_v35 = vld [vmem:[#allocation2 + $0x80] sm:$0xff] }
 0x376   : > { %4118 = vmatpush3.bf16.msra.mxu0 %v4115_v17  ;;  %4150 = vmatpush3.bf16.msra.mxu1 %v4147_v59 }
 0x377   : > { %4120 = vmatprep.subr.bf16.mxu0 %v4119_v0 }
 0x378   : > { %3806 = vmatmul.mubr.msk.f32.gmra.mrb[20].mxu0 %vm927_vm1, %v876_v7 }
 0x379   : > { %3808 = vmatprep.mubr.msk.f32.mxu0 %vm927_vm1, %v877_v14 }
 0x37a   : > { %4122 = vmatpush3.bf16.msra.mxu0 %v4119_v0  ;;  %v889_v0 = vld [vmem:[#allocation2 + $0x50] sm:$0xff] }
 0x37b   : > { %4124 = vmatprep.subr.bf16.mxu0 %v4123_v18 }
 0x37c   : > { %3809 = vmatmul.mubr.msk.f32.gmra.mrb[22].mxu0 %vm927_vm1, %v878_v23 }
 0x37e   : > { %4126 = vmatpush3.bf16.msra.mxu0 %v4123_v18 }
 0x37f   : > { %4128 = vmatprep.subr.bf16.mxu0 %v5191_v21 }
 0x3de   : > { %v3717_v19 = vpop.f32.mrb[0].mxu1 }
 0x3df   : > { %v5194_v5 = vadd.f32 %v3717_v19, %v880_v52  ;;  %v1034_v12 = vpop.f32.mrb[1].mxu1  ;;  %v898_v52 = vld [vmem:[#allocation2 + $0x98] sm:$0xff] }
 0x3e0   : > { %v5196_v31 = vadd.f32 %v1034_v12, %v879_v26 }
 0x3e1   : > { %v1560_v53 = vsel %vm1556_vm3, %v5194_v5, -inf }
 0x3e2   : > { %1561 = vmax.xlane.f32.xlu1 %v1560_v53  ;;  %v3720_v10 = vpop.f32.mrb[2].mxu1  ;;  %v1557_v34 = vsel %vm1556_vm3, %v5196_v31, -inf }
 0x3e3   : > { %v5202_v30 = vadd.f32 %v3720_v10, %v882_v22  ;;  %v1044_v24 = vpop.f32.mrb[3].mxu1  ;;  %1558 = vmax.xlane.f32.xlu0 %v1557_v34  ;;  %v897_v22 = vld [vmem:[#allocation2 + $0x90] sm:$0xff]  ;;  %v892_v34 = vld [vmem:[#allocation2 + $0x68] sm:$0xff] }
 0x3e4   : > { %v5206_v44 = vadd.f32 %v1044_v24, %v881_v25 }
 0x3e5   : > { %v1566_v41 = vsel %vm1556_vm3, %v5202_v30, -inf }
 0x3e6   : > { %v3723_v27 = vpop.f32.mrb[4].mxu1  ;;  %v1563_v60 = vsel %vm1556_vm3, %v5206_v44, -inf }
 0x3e7   : > { %v5208_v38 = vadd.f32 %v3723_v27, %v884_v36  ;;  %v1054_v55 = vpop.f32.mrb[5].mxu1  ;;  %1567 = vmax.xlane.f32.xlu0 %v1566_v41  ;;  %v891_v41 = vld [vmem:[#allocation2 + $0x60] sm:$0xff] }
 0x3e8   : > { %v5212_v48 = vadd.f32 %v1054_v55, %v883_v33 }
 0x3e9   : > { %v1572_v39 = vsel %vm1556_vm3, %v5208_v38, -inf }
 0x3ea   : > { %1573 = vmax.xlane.f32.xlu1 %v1572_v39  ;;  %v3726_v58 = vpop.f32.mrb[6].mxu1  ;;  %v1569_v37 = vsel %vm1556_vm3, %v5212_v48, -inf  ;;  %v900_v39 = vld [vmem:[#allocation2 + $0xa8] sm:$0xff] }
 0x3eb   : > { %v5216_v61 = vadd.f32 %v3726_v58, %v886_v56  ;;  %v1064_v49 = vpop.f32.mrb[7].mxu1  ;;  %1564 = vmax.xlane.f32.xlu0 %v1563_v60 }
 0x3ec   : > { %v5220_v1 = vadd.f32 %v1064_v49, %v885_v20  ;;  %v899_v20 = vld [vmem:[#allocation2 + $0xa0] sm:$0xff] }
 0x3ed   : > { %v1578_v63 = vsel %vm1556_vm3, %v5216_v61, -inf }
 0x3ee   : > { %1579 = vmax.xlane.f32.xlu1 %v1578_v63  ;;  %v1575_v3 = vsel %vm1556_vm3, %v5220_v1, -inf }
 0x3ef   : > { %1570 = vmax.xlane.f32.xlu0 %v1569_v37 }
 0x3f3   : > { %1576 = vmax.xlane.f32.xlu0 %v1575_v3 }
 0x423   : > { %v3745_v6 = vpop.f32.mrb[8].mxu0 }
 0x424   : > { %v5226_v8 = vadd.f32 %v3745_v6, %v888_v43  ;;  %v1195_v9 = vpop.f32.mrb[9].mxu0 }
 0x425   : > { %v5228_v11 = vadd.f32 %v1195_v9, %v887_v4  ;;  %v894_v4 = vld [vmem:[#allocation2 + $0x78] sm:$0xff] }
 0x426   : > { %v1584_v57 = vsel %vm1556_vm3, %v5226_v8, -inf }
 0x427   : > { %v3748_v13 = vpop.f32.mrb[10].mxu0  ;;  %1585 = vmax.xlane.f32.xlu1 %v1584_v57  ;;  %v1581_v45 = vsel %vm1556_vm3, %v5228_v11, -inf }
 0x428   : > { %v1205_v15 = vpop.f32.mrb[11].mxu0  ;;  %1582 = vmax.xlane.f32.xlu0 %v1581_v45  ;;  %v5238_v46 = vadd.f32 %v3748_v13, %v890_v40  ;;  %v893_v13 = vld [vmem:[#allocation2 + $0x70] sm:$0xff] }
 0x429   : > { %v5242_v23 = vadd.f32 %v1205_v15, %v889_v0 }
 0x42a   : > { %v1590_v10 = vsel %vm1556_vm3, %v5238_v46, -inf }
 0x42b   : > { %v3751_v47 = vpop.f32.mrb[12].mxu0  ;;  %v1587_v36 = vsel %vm1556_vm3, %v5242_v23, -inf }
 0x42c   : > { %v1215_v16 = vpop.f32.mrb[13].mxu0  ;;  %v5254_v55 = vadd.f32 %v3751_v47, %v892_v34 }
 0x42d   : > { %v5258_v56 = vadd.f32 %v1215_v16, %v891_v41  ;;  %v905_v41 = vld [vmem:[#allocation2 + $0xd0] sm:$0xff] }
 0x42e   : > { %v1596_v43 = vsel %vm1556_vm3, %v5254_v55, -inf }
 0x42f   : > { %v3754_v17 = vpop.f32.mrb[14].mxu0  ;;  %v1593_v57 = vsel %vm1556_vm3, %v5258_v56, -inf }
 0x430   : > { %v1225_v59 = vpop.f32.mrb[15].mxu0  ;;  %v5270_v15 = vadd.f32 %v3754_v17, %v894_v4 }
 0x431   : > { %v5274_v16 = vadd.f32 %v1225_v59, %v893_v13  ;;  %v5320_v13 = vpop.permute.xlu1 %4373 }
 0x432   : > { %v1602_v17 = vsel %vm1556_vm3, %v5270_v15, -inf }
 0x433   : > { %v1599_v59 = vsel %vm1556_vm3, %v5274_v16, -inf }
 0x437   : > { %v3773_v51 = vpop.f32.mrb[8].mxu1 }
 0x438   : > { %v5234_v7 = vadd.f32 %v3773_v51, %v896_v2  ;;  %v1356_v14 = vpop.f32.mrb[9].mxu1  ;;  %v902_v2 = vld [vmem:[#allocation2 + $0xb8] sm:$0xff]  ;;  %v901_v51 = vld [vmem:[#allocation2 + $0xb0] sm:$0xff] }
 0x439   : > { %v5236_v42 = vadd.f32 %v1356_v14, %v895_v35 }
 0x43a   : > { %v1608_v18 = vsel %vm1556_vm3, %v5234_v7, -inf }
 0x43b   : > { %1609 = vmax.xlane.f32.xlu1 %v1608_v18  ;;  %v3776_v26 = vpop.f32.mrb[10].mxu1  ;;  %v1605_v19 = vsel %vm1556_vm3, %v5236_v42, -inf  ;;  %v904_v18 = vld [vmem:[#allocation2 + $0xc8] sm:$0xff] }
 0x43c   : > { %v1366_v12 = vpop.f32.mrb[11].mxu1  ;;  %1606 = vmax.xlane.f32.xlu0 %v1605_v19  ;;  %v5246_v53 = vadd.f32 %v3776_v26, %v898_v52  ;;  %v903_v19 = vld [vmem:[#allocation2 + $0xc0] sm:$0xff] }
 0x43d   : > { %v5250_v24 = vadd.f32 %v1366_v12, %v897_v22 }
 0x43e   : > { %v1614_v33 = vsel %vm1556_vm3, %v5246_v53, -inf }
 0x43f   : > { %1591 = vmax.xlane.f32.xlu1 %v1590_v10  ;;  %v3779_v25 = vpop.f32.mrb[12].mxu1  ;;  %v1611_v49 = vsel %vm1556_vm3, %v5250_v24, -inf }
 0x440   : > { %v1376_v27 = vpop.f32.mrb[13].mxu1  ;;  %1588 = vmax.xlane.f32.xlu0 %v1587_v36  ;;  %v5262_v3 = vadd.f32 %v3779_v25, %v900_v39  ;;  %v906_v25 = vld [vmem:[#allocation2 + $0xd8] sm:$0xff] }
 0x441   : > { %v5266_v6 = vadd.f32 %v1376_v27, %v899_v20 }
 0x442   : > { %v1620_v47 = vsel %vm1556_vm3, %v5262_v3, -inf }
 0x443   : > { %v3801_v58 = vpop.f32.mrb[16].mxu0  ;;  %1615 = vmax.xlane.f32.xlu1 %v1614_v33  ;;  %v3782_v60 = vpop.f32.mrb[14].mxu1  ;;  %v1617_v40 = vsel %vm1556_vm3, %v5266_v6, -inf }
 0x444   : > { %v1386_v63 = vpop.f32.mrb[15].mxu1  ;;  %v1517_v37 = vpop.f32.mrb[17].mxu0  ;;  %1612 = vmax.xlane.f32.xlu0 %v1611_v49  ;;  %v5278_v14 = vadd.f32 %v3782_v60, %v902_v2  ;;  %v5290_v22 = vadd.f32 %v3801_v58, %v904_v18  ;;  %v908_v58 = vld [vmem:[#allocation2 + $0xe8] sm:$0xff]  ;;  %v907_v49 = vld [vmem:[#allocation2 + $0xe0] sm:$0xff] }
 0x445   : > { %v5282_v52 = vadd.f32 %v1386_v63, %v901_v51  ;;  %v5294_v34 = vadd.f32 %v1517_v37, %v903_v19 }
 0x446   : > { %v1626_v10 = vsel %vm1556_vm3, %v5278_v14, -inf  ;;  %v1632_v33 = vsel %vm1556_vm3, %v5290_v22, -inf }
 0x447   : > { %v3804_v9 = vpop.f32.mrb[18].mxu0  ;;  %1597 = vmax.xlane.f32.xlu1 %v1596_v43  ;;  %v1623_v36 = vsel %vm1556_vm3, %v5282_v52, -inf  ;;  %v1629_v60 = vsel %vm1556_vm3, %v5294_v34, -inf }
 0x448   : > { %v1527_v45 = vpop.f32.mrb[19].mxu0  ;;  %1594 = vmax.xlane.f32.xlu0 %v1593_v57  ;;  %v5298_v27 = vadd.f32 %v3804_v9, %v906_v25  ;;  %v5318_v57 = vpop.permute.xlu0 %4383 }
 0x449   : > { %v5302_v39 = vadd.f32 %v1527_v45, %v905_v41 }
 0x44a   : > { %v1638_v63 = vsel %vm1556_vm3, %v5298_v27, -inf }
 0x44b   : > { %v3807_v35 = vpop.f32.mrb[20].mxu0  ;;  %1621 = vmax.xlane.f32.xlu1 %v1620_v47  ;;  %v1635_v43 = vsel %vm1556_vm3, %v5302_v39, -inf }
 0x44c   : > { %v1537_v0 = vpop.f32.mrb[21].mxu0  ;;  %1618 = vmax.xlane.f32.xlu0 %v1617_v40  ;;  %v5306_v20 = vadd.f32 %v3807_v35, %v908_v58  ;;  %v5322_v45 = vpop.permute.xlu0 %4388  ;;  %v910_v58 = vld [vmem:[#allocation2 + $0xf8] sm:$0xff] }
 0x44d   : > { %v5310_v37 = vadd.f32 %v1537_v0, %v907_v49  ;;  %v909_v49 = vld [vmem:[#allocation2 + $0xf0] sm:$0xff] }
 0x44e   : > { %v1644_v4 = vsel %vm1556_vm3, %v5306_v20, -inf }
 0x44f   : > { %v5284_v26 = vpop.f32.mrb[22].mxu0  ;;  %1603 = vmax.xlane.f32.xlu1 %v1602_v17  ;;  %v1641_v9 = vsel %vm1556_vm3, %v5310_v37, -inf }
 0x450   : > { %v5288_v12 = vpop.f32.mrb[23].mxu0  ;;  %1600 = vmax.xlane.f32.xlu0 %v1599_v59 }
 0x453   : > { %1627 = vmax.xlane.f32.xlu1 %v1626_v10 }
 0x454   : > { %1624 = vmax.xlane.f32.xlu0 %v1623_v36 }
 0x457   : > { %1633 = vmax.xlane.f32.xlu1 %v1632_v33 }
 0x458   : > { %1630 = vmax.xlane.f32.xlu0 %v1629_v60 }
 0x45b   : > { %1639 = vmax.xlane.f32.xlu1 %v1638_v63 }
 0x45c   : > { %1636 = vmax.xlane.f32.xlu0 %v1635_v43 }
 0x45f   : > { %1645 = vmax.xlane.f32.xlu1 %v1644_v4 }
 0x460   : > { %1642 = vmax.xlane.f32.xlu0 %v1641_v9 }
 0x46f   : > { %v1562_v47 = vpop.xlane.xlu1 %1561 }
 0x470   : > { %v1654_v2 = vsub.f32 %v5194_v5, %v1562_v47  ;;  %v1559_v35 = vpop.xlane.xlu0 %1558 }
 0x471   : > { %v1653_v40 = vsub.f32 %v5196_v31, %v1559_v35 }
 0x472   : > { %v1687_v51 = vmul.f32 1.442695, %v1654_v2 }
 0x473   : > { %v1685_v0 = vmul.f32 1.442695, %v1653_v40 }
 0x474   : > { %4428 = vpow2.f32 %v1687_v51  ;;  %v1568_v17 = vpop.xlane.xlu0 %1567 }
 0x475   : > { %4430 = vpow2.f32 %v1685_v0  ;;  %v1656_v18 = vsub.f32 %v5202_v30, %v1568_v17 }
 0x477   : > { %v1691_v59 = vmul.f32 1.442695, %v1656_v18  ;;  %v1574_v19 = vpop.xlane.xlu1 %1573 }
 0x478   : > { %v1658_v10 = vsub.f32 %v5208_v38, %v1574_v19  ;;  %v1565_v25 = vpop.xlane.xlu0 %1564 }
 0x479   : > { %v1655_v36 = vsub.f32 %v5206_v44, %v1565_v25  ;;  %4432 = vpow2.f32 %v1691_v59  ;;  %v5336_v44 = vadd.f32 %v5284_v26, %v910_v58 }
 0x47a   : > { %v1695_v41 = vmul.f32 1.442695, %v1658_v10 }
 0x47b   : > { %v1689_v5 = vmul.f32 1.442695, %v1655_v36  ;;  %v1580_v33 = vpop.xlane.xlu1 %1579  ;;  %v1650_v26 = vsel %vm1556_vm3, %v5336_v44, -inf }
 0x47c   : > { %v1660_v31 = vsub.f32 %v5216_v61, %v1580_v33  ;;  %v1571_v60 = vpop.xlane.xlu0 %1570  ;;  %v5341_v61 = vadd.f32 %v5288_v12, %v909_v49 }
 0x47d   : > { %4434 = vpow2.f32 %v1689_v5  ;;  %v1657_v63 = vsub.f32 %v5212_v48, %v1571_v60 }
 0x47e   : > { %v5331_v30 = vpop.eup %4428  ;;  %4436 = vpow2.f32 %v1695_v41  ;;  %v1699_v43 = vmul.f32 1.442695, %v1660_v31  ;;  %v1647_v12 = vsel %vm1556_vm3, %v5341_v61, -inf }
 0x47f   : > { %v5333_v38 = vpop.eup %4430  ;;  %v1693_v4 = vmul.f32 1.442695, %v1657_v63  ;;  %v1752_v9 = vsel %vm1556_vm3, %v5331_v30, 0.0 }
 0x480   : > { %1753 = vadd.xlane.f32.xlu1 %v1752_v9  ;;  %v1577_v47 = vpop.xlane.xlu0 %1576  ;;  %v1749_v48 = vsel %vm1556_vm3, %v5333_v38, 0.0 }
 0x481   : > { %4438 = vpow2.f32 %v1693_v4  ;;  %v1659_v2 = vsub.f32 %v5220_v1, %v1577_v47  ;;  %1750 = vadd.xlane.f32.xlu0 %v1749_v48 }
 0x482   : > { %4440 = vpow2.f32 %v1699_v43 }
 0x483   : > { %v1697_v35 = vmul.f32 1.442695, %v1659_v2  ;;  %v5348_v40 = vpop.eup %4432 }
 0x484   : > { %1651 = vmax.xlane.f32.xlu1 %v1650_v26  ;;  %v1758_v0 = vsel %vm1556_vm3, %v5348_v40, 0.0 }
 0x485   : > { %1648 = vmax.xlane.f32.xlu0 %v1647_v12  ;;  %4442 = vpow2.f32 %v1697_v35 }
 0x487   : > { %v5352_v51 = vpop.eup %4434 }
 0x488   : > { %v5356_v1 = vpop.eup %4436  ;;  %1759 = vadd.xlane.f32.xlu1 %v1758_v0  ;;  %v1755_v17 = vsel %vm1556_vm3, %v5352_v51, 0.0 }
 0x489   : > { %1756 = vadd.xlane.f32.xlu0 %v1755_v17  ;;  %v1764_v59 = vsel %vm1556_vm3, %v5356_v1, 0.0 }
 0x48b   : > { %v5360_v18 = vpop.eup %4438 }
 0x48c   : > { %v5364_v19 = vpop.eup %4440  ;;  %1765 = vadd.xlane.f32.xlu1 %v1764_v59  ;;  %v1761_v10 = vsel %vm1556_vm3, %v5360_v18, 0.0 }
 0x48d   : > { %1762 = vadd.xlane.f32.xlu0 %v1761_v10  ;;  %v1770_v25 = vsel %vm1556_vm3, %v5364_v19, 0.0 }
 0x48f   : > { %v5370_v36 = vpop.eup %4442 }
 0x490   : > { %1771 = vadd.xlane.f32.xlu1 %v1770_v25  ;;  %v1767_v41 = vsel %vm1556_vm3, %v5370_v36, 0.0 }
 0x494   : > { %1768 = vadd.xlane.f32.xlu1 %v1767_v41 }
 0x4b4   : > { %v1586_v5 = vpop.xlane.xlu1 %1585 }
 0x4b5   : > { %v1662_v33 = vsub.f32 %v5226_v8, %v1586_v5  ;;  %v1583_v60 = vpop.xlane.xlu0 %1582 }
 0x4b6   : > { %v1661_v63 = vsub.f32 %v5228_v11, %v1583_v60 }
 0x4b7   : > { %v1703_v58 = vmul.f32 1.442695, %v1662_v33 }
 0x4b8   : > { %v1701_v48 = vmul.f32 1.442695, %v1661_v63 }
 0x4b9   : > { %4444 = vpow2.f32 %v1703_v58 }
 0x4c3   : > { %v5375_v31 = vpop.eup %4444 }
 0x4c4   : > { %v1776_v49 = vsel %vm1556_vm3, %v5375_v31, 0.0 }
 0x4c5   : > { %1777 = vadd.xlane.f32.xlu1 %v1776_v49 }
 0x4c8   : > { %v1610_v43 = vpop.xlane.xlu1 %1609 }
 0x4c9   : > { %v1670_v4 = vsub.f32 %v5234_v7, %v1610_v43  ;;  %v1607_v9 = vpop.xlane.xlu0 %1606 }
 0x4ca   : > { %v1669_v47 = vsub.f32 %v5236_v42, %v1607_v9 }
 0x4cb   : > { %v1719_v2 = vmul.f32 1.442695, %v1670_v4 }
 0x4cc   : > { %v1717_v8 = vmul.f32 1.442695, %v1669_v47  ;;  %v1592_v35 = vpop.xlane.xlu1 %1591 }
 0x4cd   : > { %4446 = vpow2.f32 %v1719_v2  ;;  %v1664_v26 = vsub.f32 %v5238_v46, %v1592_v35  ;;  %v1589_v12 = vpop.xlane.xlu0 %1588 }
 0x4ce   : > { %4448 = vpow2.f32 %v1717_v8  ;;  %v1663_v0 = vsub.f32 %v5242_v23, %v1589_v12 }
 0x4cf   : > { %4450 = vpow2.f32 %v1701_v48  ;;  %v1707_v17 = vmul.f32 1.442695, %v1664_v26 }
 0x4d0   : > { %v1705_v11 = vmul.f32 1.442695, %v1663_v0  ;;  %v1616_v59 = vpop.xlane.xlu1 %1615 }
 0x4d1   : > { %4452 = vpow2.f32 %v1707_v17  ;;  %v1672_v7 = vsub.f32 %v5246_v53, %v1616_v59  ;;  %v1613_v10 = vpop.xlane.xlu0 %1612 }
 0x4d2   : > { %v1671_v42 = vsub.f32 %v5250_v24, %v1613_v10  ;;  %4454 = vpow2.f32 %v1705_v11 }
 0x4d3   : > { %v1723_v25 = vmul.f32 1.442695, %v1672_v7 }
 0x4d4   : > { %v1721_v41 = vmul.f32 1.442695, %v1671_v42  ;;  %v1598_v5 = vpop.xlane.xlu1 %1597 }
 0x4d5   : > { %4456 = vpow2.f32 %v1723_v25  ;;  %v1666_v46 = vsub.f32 %v5254_v55, %v1598_v5  ;;  %v1595_v33 = vpop.xlane.xlu0 %1594 }
 0x4d6   : > { %v1665_v23 = vsub.f32 %v5258_v56, %v1595_v33  ;;  %4458 = vpow2.f32 %v1721_v41 }
 0x4d7   : > { %v5387_v58 = vpop.eup %4446  ;;  %v1711_v49 = vmul.f32 1.442695, %v1666_v46 }
 0x4d8   : > { %v5390_v60 = vpop.eup %4448  ;;  %v1622_v53 = vpop.xlane.xlu1 %1621  ;;  %v1800_v24 = vsel %vm1556_vm3, %v5387_v58, 0.0  ;;  %v1709_v47 = vmul.f32 1.442695, %v1665_v23 }
 0x4d9   : > { %v5394_v63 = vpop.eup %4450  ;;  %v1674_v43 = vsub.f32 %v5262_v3, %v1622_v53  ;;  %1801 = vadd.xlane.f32.xlu0 %v1800_v24  ;;  %v1619_v4 = vpop.xlane.xlu0 %1618  ;;  %v1797_v55 = vsel %vm1556_vm3, %v5390_v60, 0.0  ;;  %4460 = vpow2.f32 %v1711_v49 }
 0x4da   : > { %v1673_v9 = vsub.f32 %v5266_v6, %v1619_v4  ;;  %1798 = vadd.xlane.f32.xlu1 %v1797_v55  ;;  %v1773_v35 = vsel %vm1556_vm3, %v5394_v63, 0.0 }
 0x4db   : > { %v5400_v56 = vpop.eup %4452  ;;  %v1727_v48 = vmul.f32 1.442695, %v1674_v43 }
 0x4dc   : > { %v1725_v2 = vmul.f32 1.442695, %v1673_v9  ;;  %v1604_v8 = vpop.xlane.xlu1 %1603  ;;  %v1782_v3 = vsel %vm1556_vm3, %v5400_v56, 0.0  ;;  %v5407_v6 = vpop.eup %4454 }
 0x4dd   : > { %4462 = vpow2.f32 %v1727_v48  ;;  %v1668_v26 = vsub.f32 %v5270_v15, %v1604_v8  ;;  %1774 = vadd.xlane.f32.xlu0 %v1773_v35  ;;  %v1601_v12 = vpop.xlane.xlu0 %1600  ;;  %v1779_v15 = vsel %vm1556_vm3, %v5407_v6, 0.0 }
 0x4de   : > { %1783 = vadd.xlane.f32.xlu1 %v1782_v3  ;;  %4464 = vpow2.f32 %v1709_v47  ;;  %v1667_v41 = vsub.f32 %v5274_v16, %v1601_v12 }
 0x4df   : > { %v5409_v0 = vpop.eup %4456  ;;  %4466 = vpow2.f32 %v1725_v2  ;;  %v1715_v17 = vmul.f32 1.442695, %v1668_v26 }
 0x4e0   : > { %v1628_v11 = vpop.xlane.xlu1 %1627  ;;  %v1806_v59 = vsel %vm1556_vm3, %v5409_v0, 0.0  ;;  %v5416_v42 = vpop.eup %4458  ;;  %v1713_v24 = vmul.f32 1.442695, %v1667_v41 }
 0x4e1   : > { %v1676_v7 = vsub.f32 %v5278_v14, %v1628_v11  ;;  %1807 = vadd.xlane.f32.xlu0 %v1806_v59  ;;  %v1625_v10 = vpop.xlane.xlu0 %1624  ;;  %4468 = vpow2.f32 %v1715_v17  ;;  %v1803_v14 = vsel %vm1556_vm3, %v5416_v42, 0.0 }
 0x4e2   : > { %v1675_v25 = vsub.f32 %v5282_v52, %v1625_v10  ;;  %1780 = vadd.xlane.f32.xlu1 %v1779_v15 }
 0x4e3   : > { %v1731_v5 = vmul.f32 1.442695, %v1676_v7  ;;  %v5422_v49 = vpop.eup %4460 }
 0x4e4   : > { %v1729_v46 = vmul.f32 1.442695, %v1675_v25  ;;  %v1634_v33 = vpop.xlane.xlu1 %1633  ;;  %v1788_v47 = vsel %vm1556_vm3, %v5422_v49, 0.0 }
 0x4e5   : > { %v1631_v23 = vpop.xlane.xlu0 %1630  ;;  %v1678_v52 = vsub.f32 %v5290_v22, %v1634_v33 }
 0x4e6   : > { %4470 = vpow2.f32 %v1729_v46  ;;  %1804 = vadd.xlane.f32.xlu1 %v1803_v14  ;;  %v1677_v35 = vsub.f32 %v5294_v34, %v1631_v23 }
 0x4e7   : > { %v5424_v53 = vpop.eup %4462  ;;  %4472 = vpow2.f32 %v1731_v5  ;;  %v1735_v8 = vmul.f32 1.442695, %v1678_v52 }
 0x4e8   : > { %v1640_v43 = vpop.xlane.xlu1 %1639  ;;  %v1812_v16 = vsel %vm1556_vm3, %v5424_v53, 0.0  ;;  %v5429_v4 = vpop.eup %4464  ;;  %4474 = vpow2.f32 %v1713_v24  ;;  %v1733_v11 = vmul.f32 1.442695, %v1677_v35 }
 0x4e9   : > { %v1680_v55 = vsub.f32 %v5298_v27, %v1640_v43  ;;  %1813 = vadd.xlane.f32.xlu0 %v1812_v16  ;;  %v1637_v9 = vpop.xlane.xlu0 %1636  ;;  %v5434_v48 = vpop.eup %4466  ;;  %v1785_v26 = vsel %vm1556_vm3, %v5429_v4, 0.0 }
 0x4ea   : > { %v1679_v2 = vsub.f32 %v5302_v39, %v1637_v9  ;;  %1789 = vadd.xlane.f32.xlu1 %v1788_v47  ;;  %v1809_v12 = vsel %vm1556_vm3, %v5434_v48, 0.0 }
 0x4eb   : > { %v1739_v22 = vmul.f32 1.442695, %v1680_v55  ;;  %v5442_v17 = vpop.eup %4468 }
 0x4ec   : > { %v1737_v3 = vmul.f32 1.442695, %v1679_v2  ;;  %v1646_v27 = vpop.xlane.xlu1 %1645  ;;  %v1794_v7 = vsel %vm1556_vm3, %v5442_v17, 0.0 }
 0x4ed   : > { %4476 = vpow2.f32 %v1739_v22  ;;  %1786 = vadd.xlane.f32.xlu0 %v1785_v26  ;;  %v1682_v34 = vsub.f32 %v5306_v20, %v1646_v27  ;;  %v1643_v59 = vpop.xlane.xlu0 %1642 }
 0x4ee   : > { %1810 = vadd.xlane.f32.xlu1 %v1809_v12  ;;  %4478 = vpow2.f32 %v1737_v3  ;;  %v1681_v41 = vsub.f32 %v5310_v37, %v1643_v59  ;;  %v4361_v59 = vunpack.i.h.bf16 %v5161_v62 }
 0x4ef   : > { %4480 = vpow2.f32 %v1735_v8  ;;  %v1743_v25 = vmul.f32 1.442695, %v1682_v34 }
 0x4f0   : > { %v5444_v39 = vpop.eup %4470  ;;  %4482 = vpow2.f32 %v1733_v11  ;;  %v1741_v33 = vmul.f32 1.442695, %v1681_v41 }
 0x4f1   : > { %v1815_v10 = vsel %vm1556_vm3, %v5444_v39, 0.0  ;;  %v5451_v15 = vpop.eup %4472  ;;  %4484 = vpow2.f32 %v1743_v25 }
 0x4f2   : > { %1795 = vadd.xlane.f32.xlu1 %v1794_v7  ;;  %1816 = vadd.xlane.f32.xlu0 %v1815_v10  ;;  %v5454_v5 = vpop.eup %4474  ;;  %v1818_v20 = vsel %vm1556_vm3, %v5451_v15, 0.0  ;;  %4486 = vpow2.f32 %v1741_v33  ;;  %v4360_v7 = vunpack.i.l.bf16 %v5161_v62 }
 0x4f3   : > { %v1791_v24 = vsel %vm1556_vm3, %v5454_v5, 0.0 }
 0x4f4   : > { %v4131_v62 = vpack.c.bf16 %v4361_v59, %v4360_v7 }
 0x4f6   : > { %1819 = vadd.xlane.f32.xlu1 %v1818_v20  ;;  %v4365_v20 = vunpack.i.l.bf16 %v5163_v32 }
 0x4f7   : > { %v5458_v46 = vpop.eup %4476 }
 0x4f8   : > { %v1830_v23 = vsel %vm1556_vm3, %v5458_v46, 0.0  ;;  %v5462_v14 = vpop.eup %4478 }
 0x4f9   : > { %1831 = vadd.xlane.f32.xlu0 %v1830_v23  ;;  %v5466_v37 = vpop.eup %4480  ;;  %v1827_v52 = vsel %vm1556_vm3, %v5462_v14, 0.0 }
 0x4fa   : > { %1792 = vadd.xlane.f32.xlu1 %v1791_v24  ;;  %v1824_v43 = vsel %vm1556_vm3, %v5466_v37, 0.0  ;;  %v5472_v16 = vpop.eup %4482 }
 0x4fb   : > { %v1821_v55 = vsel %vm1556_vm3, %v5472_v16, 0.0  ;;  %v5476_v9 = vpop.eup %4484 }
 0x4fc   : > { %v1836_v47 = vsel %vm1556_vm3, %v5476_v9, 0.0  ;;  %v5480_v2 = vpop.eup %4486 }
 0x4fd   : > { %1828 = vadd.xlane.f32.xlu0 %v1827_v52  ;;  %v1833_v22 = vsel %vm1556_vm3, %v5480_v2, 0.0 }
 0x4fe   : > { %1825 = vadd.xlane.f32.xlu1 %v1824_v43 }
 0x502   : > { %1822 = vadd.xlane.f32.xlu1 %v1821_v55 }
 0x506   : > { %1837 = vadd.xlane.f32.xlu1 %v1836_v47 }
 0x50a   : > { %1834 = vadd.xlane.f32.xlu1 %v1833_v22  ;;  %v4375_v22 = vunpack.i.l.bf16 %v5320_v13 }
 0x50d   : > { %v1754_v8 = vpop.xlane.xlu1 %1753 }
 0x50e   : > { %4488 = vrcp.f32 %v1754_v8  ;;  %v1751_v35 = vpop.xlane.xlu0 %1750 }
 0x50f   : > { %4490 = vrcp.f32 %v1751_v35 }
 0x511   : > { %v1652_v3 = vpop.xlane.xlu1 %1651 }
 0x512   : > { %v1649_v26 = vpop.xlane.xlu0 %1648 }
 0x513   : > { %4398 = vrot.lane.b32.xlu0 %v5012_v50, %s4643_s27  ;;  %v1683_v55 = vsub.f32 %v5341_v61, %v1649_v26 }
 0x515   : > { %v1760_v27 = vpop.xlane.xlu1 %1759 }
 0x516   : > { %v1757_v12 = vpop.xlane.xlu0 %1756  ;;  %4492 = vrcp.f32 %v1760_v27  ;;  %v1745_v27 = vmul.f32 1.442695, %v1683_v55 }
 0x517   : > { %4403 = vrot.lane.b32.xlu0 %v5022_v29, %s4643_s27  ;;  %4494 = vrcp.f32 %v1757_v12  ;;  %v4366_v29 = vunpack.i.h.bf16 %v5163_v32 }
 0x518   : > { %v4489_v11 = vpop.eup %4488 }
 0x519   : > { %v4491_v34 = vpop.eup %4490  ;;  %v1766_v10 = vpop.xlane.xlu1 %1765  ;;  %v1848_v41 = vmul.f32 %v4489_v11, %v5331_v30  ;;  %v4390_v30 = vunpack.i.l.bf16 %v5322_v45  ;;  %v4135_v24 = vpack.c.bf16 %v4366_v29, %v4365_v20 }
 0x51a   : > { %v1763_v25 = vpop.xlane.xlu0 %1762  ;;  %v1846_v50 = vmul.f32 %v4491_v34, %v5333_v38  ;;  %v4391_v38 = vunpack.i.h.bf16 %v5322_v45 }
 0x51b   : > { %4393 = vrot.lane.b32.xlu1 %v5002_v28, %s4643_s27  ;;  %4496 = vrcp.f32 %v1763_v25  ;;  %v1684_v28 = vsub.f32 %v5336_v44, %v1652_v3  ;;  %v4376_v44 = vunpack.i.h.bf16 %v5320_v13 }
 0x51c   : > { %4498 = vrcp.f32 %v1766_v10  ;;  %3827 = vmatprep.mubr.msk.f32.mxu0 %vm1556_vm3, %v1846_v50  ;;  %v4139_v8 = vpack.c.bf16 %v4391_v38, %v4390_v30 }
 0x51d   : > { %v1772_v33 = vpop.xlane.xlu1 %1771  ;;  %3828 = vmatmul.mubr.msk.f32.vlgmr.msra.gmra.mrb[24].mxu0 %vm1556_vm3, %v1848_v41  ;;  %v1747_v43 = vmul.f32 1.442695, %v1684_v28  ;;  %v4385_v28 = vunpack.i.l.bf16 %v5318_v57 }
 0x51e   : > { %4130 = vmatpush3.bf16.msra.mxu0 %v5191_v21  ;;  %4500 = vrcp.f32 %v1772_v33 }
 0x51f   : > { %4132 = vmatprep.subr.bf16.mxu0 %v4131_v62 }
 0x520   : > { %v4493_v52 = vpop.eup %4492 }
 0x521   : > { %v1769_v23 = vpop.xlane.xlu1 %1768  ;;  %v4495_v32 = vpop.eup %4494  ;;  %v1852_v45 = vmul.f32 %v4493_v52, %v5348_v40 }
 0x522   : > { %4502 = vrcp.f32 %v1769_v23  ;;  %4134 = vmatpush3.bf16.msra.mxu0 %v4131_v62  ;;  %v1850_v21 = vmul.f32 %v4495_v32, %v5352_v51  ;;  %v4159_v51 = vpack.c.bf16 %v4376_v44, %v4375_v22  ;;  %v4386_v62 = vunpack.i.h.bf16 %v5318_v57 }
 0x523   : > { %4136 = vmatprep.subr.bf16.mxu0 %v4135_v24  ;;  %4504 = vpow2.f32 %v1747_v43 }
 0x524   : > { %3830 = vmatprep.mubr.msk.f32.mxu0 %vm1556_vm3, %v1850_v21  ;;  %4506 = vpow2.f32 %v1745_v27 }
 0x525   : > { %v4497_v47 = vpop.eup %4496  ;;  %3831 = vmatmul.mubr.msk.f32.gmra.mrb[26].mxu0 %vm1556_vm3, %v1852_v45 }
 0x526   : > { %v4499_v35 = vpop.eup %4498  ;;  %4138 = vmatpush3.bf16.msra.mxu0 %v4135_v24  ;;  %v1854_v3 = vmul.f32 %v4497_v47, %v5360_v18 }
 0x527   : > { %4140 = vmatprep.subr.bf16.mxu0 %v4139_v8  ;;  %v1856_v61 = vmul.f32 %v4499_v35, %v5356_v1 }
 0x528   : > { %3833 = vmatprep.mubr.msk.f32.mxu0 %vm1556_vm3, %v1854_v3  ;;  %v4501_v13 = vpop.eup %4500 }
 0x529   : > { %3834 = vmatmul.mubr.msk.f32.gmra.mrb[28].mxu0 %vm1556_vm3, %v1856_v61  ;;  %v1860_v18 = vmul.f32 %v4501_v13, %v5364_v19 }
 0x52a   : > { %4142 = vmatpush3.bf16.msra.mxu0 %v4139_v8 }
 0x52b   : > { %4160 = vmatprep.subr.bf16.mxu0 %v4159_v51 }
 0x52c   : > { %v4503_v40 = vpop.eup %4502 }
 0x52d   : > { %v1858_v26 = vmul.f32 %v4503_v40, %v5370_v36  ;;  %v5517_v12 = vpop.eup %4504 }
 0x52e   : > { %v1842_v1 = vsel %vm1556_vm3, %v5517_v12, 0.0  ;;  %v5521_v11 = vpop.eup %4506 }
 0x52f   : > { %3836 = vmatprep.mubr.msk.f32.mxu0 %vm1556_vm3, %v1858_v26  ;;  %v1839_v34 = vsel %vm1556_vm3, %v5521_v11, 0.0 }
 0x530   : > { %3837 = vmatmul.mubr.msk.f32.gmra.mrb[30].mxu0 %vm1556_vm3, %v1860_v18 }
 0x536   : > { %1843 = vadd.xlane.f32.xlu0 %v1842_v1 }
 0x53a   : > { %1840 = vadd.xlane.f32.xlu0 %v1839_v34 }
 0x550   : > { %4408 = vrot.lane.b32.xlu0 %v5030_v54, %s4643_s27  ;;  %s482_s27 = scalar_lea.vmem %s5911_s14, %s3489_s18 }
 0x552   : > { %v1778_v19 = vpop.xlane.xlu1 %1777 }
 0x566   : > { %v5527_v36 = vpop.xlane.xlu0 %1801 }
 0x567   : > { %v1799_v59 = vpop.xlane.xlu1 %1798 }
 0x568   : > { %4508 = vrcp.f32 %v1799_v59 }
 0x569   : > { %4510 = vrcp.f32 %v1778_v19 }
 0x56a   : > { %v1775_v7 = vpop.xlane.xlu0 %1774 }
 0x56b   : > { %4512 = vrcp.f32 %v1775_v7  ;;  %v1784_v10 = vpop.xlane.xlu1 %1783 }
 0x56c   : > { %4514 = vrcp.f32 %v1784_v10 }
 0x56e   : > { %v5529_v41 = vpop.xlane.xlu0 %1807 }
 0x56f   : > { %v1781_v25 = vpop.xlane.xlu1 %1780 }
 0x570   : > { %4516 = vrcp.f32 %v1781_v25 }
 0x572   : > { %v4509_v50 = vpop.eup %4508 }
 0x573   : > { %v1805_v29 = vpop.xlane.xlu1 %1804  ;;  %v1878_v20 = vmul.f32 %v4509_v50, %v5390_v60  ;;  %v4511_v33 = vpop.eup %4510  ;;  %v4163_v60 = vpack.c.bf16 %v4386_v62, %v4385_v28 }
 0x574   : > { %v1864_v23 = vmul.f32 %v4511_v33, %v5375_v31 }
 0x575   : > { %v4513_v54 = vpop.eup %4512  ;;  %3883 = vmatprep.mubr.msk.f32.mxu1 %vm1556_vm3, %v1878_v20 }
 0x576   : > { %v5535_v38 = vpop.xlane.xlu0 %1813  ;;  %v1862_v30 = vmul.f32 %v4513_v54, %v5394_v63  ;;  %v4515_v52 = vpop.eup %4514 }
 0x577   : > { %v1790_v24 = vpop.xlane.xlu1 %1789  ;;  %v1868_v31 = vmul.f32 %v4515_v52, %v5400_v56 }
 0x578   : > { %3855 = vmatprep.mubr.msk.f32.mxu0 %vm1556_vm3, %v1862_v30  ;;  %4518 = vrcp.f32 %v1790_v24 }
 0x579   : > { %3856 = vmatmul.mubr.msk.f32.vlgmr.msra.gmra.mrb[32].mxu0 %vm1556_vm3, %v1864_v23 }
 0x57a   : > { %v4517_v32 = vpop.eup %4516  ;;  %4162 = vmatpush3.bf16.msra.mxu0 %v4159_v51  ;;  %v1787_v43 = vpop.xlane.xlu0 %1786 }
 0x57b   : > { %4164 = vmatprep.subr.bf16.mxu0 %v4163_v60  ;;  %4520 = vrcp.f32 %v1787_v43  ;;  %v1811_v57 = vpop.xlane.xlu1 %1810  ;;  %v1866_v55 = vmul.f32 %v4517_v32, %v5407_v6 }
 0x57d   : > { %3858 = vmatprep.mubr.msk.f32.mxu0 %vm1556_vm3, %v1866_v55 }
 0x57e   : > { %4166 = vmatpush3.bf16.msra.mxu0 %v4163_v60 }
 0x57f   : > { %3859 = vmatmul.mubr.msk.f32.gmra.mrb[34].mxu0 %vm1556_vm3, %v1868_v31  ;;  %v1796_v63 = vpop.xlane.xlu1 %1795  ;;  %v1817_v21 = vpop.xlane.xlu0 %1816 }
 0x580   : > { %4522 = vrcp.f32 %v1796_v63 }
 0x582   : > { %v4519_v44 = vpop.eup %4518 }
 0x583   : > { %v1820_v47 = vpop.xlane.xlu1 %1819  ;;  %v1872_v6 = vmul.f32 %v4519_v44, %v5422_v49 }
 0x585   : > { %v4521_v22 = vpop.eup %4520 }
 0x586   : > { %v5545_v45 = vpop.xlane.xlu0 %1831  ;;  %v1870_v8 = vmul.f32 %v4521_v22, %v5429_v4 }
 0x587   : > { %v1793_v35 = vpop.xlane.xlu1 %1792 }
 0x588   : > { %4524 = vrcp.f32 %v1793_v35  ;;  %3861 = vmatprep.mubr.msk.f32.mxu0 %vm1556_vm3, %v1870_v8 }
 0x589   : > { %3862 = vmatmul.mubr.msk.f32.gmra.mrb[36].mxu0 %vm1556_vm3, %v1872_v6 }
 0x58a   : > { %v1829_v56 = vpop.xlane.xlu0 %1828  ;;  %v4523_v40 = vpop.eup %4522 }
 0x58b   : > { %v1826_v3 = vpop.xlane.xlu1 %1825  ;;  %v1876_v49 = vmul.f32 %v4523_v40, %v5442_v17 }
 0x58e   : > { %v4399_v27 = vpop.permute.xlu0 %4398 }
 0x58f   : > { %v4401_v61 = vunpack.i.h.bf16 %v4399_v27  ;;  %v4400_v51 = vunpack.i.l.bf16 %v4399_v27  ;;  %v1823_v13 = vpop.xlane.xlu1 %1822 }
 0x590   : > { %4526 = vrcp.f32 %v1823_v13 }
 0x591   : > { %v4167_v26 = vpack.c.bf16 %v4401_v61, %v4400_v51  ;;  %4528 = vrcp.f32 %v5527_v36 }
 0x592   : > { %v4525_v18 = vpop.eup %4524  ;;  %v4404_v19 = vpop.permute.xlu0 %4403  ;;  %4530 = vrcp.f32 %v1805_v29 }
 0x593   : > { %v1838_v4 = vpop.xlane.xlu1 %1837  ;;  %4168 = vmatprep.subr.bf16.mxu0 %v4167_v26  ;;  %v1874_v1 = vmul.f32 %v4525_v18, %v5454_v5  ;;  %v4406_v25 = vunpack.i.h.bf16 %v4404_v19  ;;  %v4405_v50 = vunpack.i.l.bf16 %v4404_v19  ;;  %4532 = vrcp.f32 %v5529_v41 }
 0x594   : > { %4170 = vmatpush3.bf16.msra.mxu0 %v4167_v26  ;;  %4534 = vrcp.f32 %v1811_v57 }
 0x595   : > { %3864 = vmatprep.mubr.msk.f32.mxu0 %vm1556_vm3, %v1874_v1  ;;  %v4155_v33 = vpack.c.bf16 %v4406_v25, %v4405_v50  ;;  %4536 = vrcp.f32 %v5535_v38  ;;  %v2643_v25 = vld [vmem:[%s5903_s6] sm:$0xff]  ;;  %v2644_v50 = vld [vmem:[%s5903_s6 + $0x8] sm:$0xff] }
 0x596   : > { %3865 = vmatmul.mubr.msk.f32.gmra.mrb[38].mxu0 %vm1556_vm3, %v1876_v49  ;;  %4538 = vrcp.f32 %v1817_v21 }
 0x597   : > { %v1835_v34 = vpop.xlane.xlu1 %1834  ;;  %4540 = vrcp.f32 %v1820_v47 }
 0x598   : > { %4542 = vrcp.f32 %v1826_v3 }
 0x599   : > { %4544 = vrcp.f32 %v1829_v56 }
 0x59a   : > { %v4527_v59 = vpop.eup %4526  ;;  %4546 = vrcp.f32 %v5545_v45 }
 0x59b   : > { %v4394_v7 = vpop.permute.xlu1 %4393  ;;  %v1894_v10 = vmul.f32 %v4527_v59, %v5472_v16  ;;  %v4529_v36 = vpop.eup %4528  ;;  %4548 = vrcp.f32 %v1835_v34 }
 0x59c   : > { %v4396_v20 = vunpack.i.h.bf16 %v4394_v7  ;;  %v4395_v5 = vunpack.i.l.bf16 %v4394_v7  ;;  %v4531_v29 = vpop.eup %4530  ;;  %v1880_v16 = vmul.f32 %v4529_v36, %v5387_v58  ;;  %4550 = vrcp.f32 %v1838_v4 }
 0x59d   : > { %3911 = vmatprep.mubr.msk.f32.mxu0 %vm1556_vm3, %v1894_v10  ;;  %v4533_v54 = vpop.eup %4532  ;;  %v1882_v41 = vmul.f32 %v4531_v29, %v5416_v42 }
 0x59e   : > { %v4151_v17 = vpack.c.bf16 %v4396_v20, %v4395_v5  ;;  %v4535_v62 = vpop.eup %4534  ;;  %v1884_v28 = vmul.f32 %v4533_v54, %v5409_v0  ;;  %v2645_v20 = vld [vmem:[%s5903_s6 + $0x10] sm:$0xff]  ;;  %v4175_v5 = vpack.c.bf16 %v2644_v50, %v2643_v25 }
 0x59f   : > { %v4537_v38 = vpop.eup %4536  ;;  %v1886_v30 = vmul.f32 %v4535_v62, %v5434_v48 }
 0x5a0   : > { %4152 = vmatprep.subr.bf16.mxu1 %v4151_v17  ;;  %v4539_v23 = vpop.eup %4538  ;;  %v1888_v58 = vmul.f32 %v4537_v38, %v5424_v53 }
 0x5a1   : > { %4154 = vmatpush3.bf16.msra.mxu1 %v4151_v17  ;;  %v4541_v24 = vpop.eup %4540  ;;  %v1890_v42 = vmul.f32 %v4539_v23, %v5444_v39  ;;  %v2646_v17 = vld [vmem:[%s5903_s6 + $0x18] sm:$0xff] }
 0x5a2   : > { %4156 = vmatprep.subr.bf16.mxu1 %v4155_v33  ;;  %v1892_v52 = vmul.f32 %v4541_v24, %v5451_v15  ;;  %v4543_v43 = vpop.eup %4542 }
 0x5a3   : > { %v4545_v57 = vpop.eup %4544  ;;  %v1896_v15 = vmul.f32 %v4543_v43, %v5466_v37 }
 0x5a4   : > { %v4547_v55 = vpop.eup %4546  ;;  %v1898_v31 = vmul.f32 %v4545_v57, %v5462_v14 }
 0x5a5   : > { %4158 = vmatpush3.bf16.msra.mxu1 %v4155_v33  ;;  %v4549_v63 = vpop.eup %4548  ;;  %v1900_v21 = vmul.f32 %v4547_v55, %v5458_v46  ;;  %v4179_v33 = vpack.c.bf16 %v2646_v17, %v2645_v20 }
 0x5a6   : > { %v4551_v47 = vpop.eup %4550  ;;  %v1902_v44 = vmul.f32 %v4549_v63, %v5480_v2  ;;  %4176 = vmatprep.subr.bf16.mxu1 %v4175_v5 }
 0x5a7   : > { %v1904_v37 = vmul.f32 %v4551_v47, %v5476_v9 }
 0x5a8   : > { %3884 = vmatmul.mubr.msk.f32.vlgmr.msra.gmra.mrb[16].mxu1 %vm1556_vm3, %v1880_v16 }
 0x5a9   : > { %3886 = vmatprep.mubr.msk.f32.mxu1 %vm1556_vm3, %v1882_v41  ;;  %4178 = vmatpush3.bf16.msra.mxu1 %v4175_v5  ;;  %v4588_v5 = vld [vmem:[%s4777_s17 + $0x8] sm:$0xff] }
 0x5aa   : > { %4180 = vmatprep.subr.bf16.mxu1 %v4179_v33 }
 0x5ac   : > { %3887 = vmatmul.mubr.msk.f32.gmra.mrb[18].mxu1 %vm1556_vm3, %v1884_v28 }
 0x5ad   : > { %3889 = vmatprep.mubr.msk.f32.mxu1 %vm1556_vm3, %v1886_v30  ;;  %4182 = vmatpush3.bf16.msra.mxu1 %v4179_v33  ;;  %v4589_v33 = vld [vmem:[%s4777_s17] sm:$0xff] }
 0x5b0   : > { %3890 = vmatmul.mubr.msk.f32.gmra.mrb[20].mxu1 %vm1556_vm3, %v1888_v58 }
 0x5b1   : > { %3892 = vmatprep.mubr.msk.f32.mxu1 %vm1556_vm3, %v1890_v42 }
 0x5b4   : > { %3893 = vmatmul.mubr.msk.f32.gmra.mrb[22].mxu1 %vm1556_vm3, %v1892_v52 }
 0x5c3   : > { %v1844_v0 = vpop.xlane.xlu0 %1843 }
 0x5c7   : > { %v1841_v48 = vpop.xlane.xlu0 %1840 }
 0x5c8   : > { %4552 = vrcp.f32 %v1841_v48 }
 0x5c9   : > { %4554 = vrcp.f32 %v1844_v0 }
 0x5cb   : > { %v4409_v60 = vpop.permute.xlu0 %4408 }
 0x5cc   : > { %v4411_v53 = vunpack.i.h.bf16 %v4409_v60  ;;  %v4410_v32 = vunpack.i.l.bf16 %v4409_v60 }
 0x5ce   : > { %v4171_v39 = vpack.c.bf16 %v4411_v53, %v4410_v32 }
 0x5d0   : > { %4172 = vmatprep.subr.bf16.mxu0 %v4171_v39 }
 0x5d1   : > { %4174 = vmatpush3.bf16.msra.mxu0 %v4171_v39 }
 0x5d2   : > { %v4553_v22 = vpop.eup %4552 }
 0x5d3   : > { %v4555_v45 = vpop.eup %4554  ;;  %v1906_v14 = vmul.f32 %v4553_v22, %v5521_v11 }
 0x5d4   : > { %3912 = vmatmul.mubr.msk.f32.vlgmr.msra.gmra.mrb[40].mxu0 %vm1556_vm3, %v1896_v15  ;;  %v1908_v8 = vmul.f32 %v4555_v45, %v5517_v12 }
 0x5d5   : > { %3914 = vmatprep.mubr.msk.f32.mxu0 %vm1556_vm3, %v1898_v31 }
 0x5d8   : > { %3915 = vmatmul.mubr.msk.f32.gmra.mrb[42].mxu0 %vm1556_vm3, %v1900_v21 }
 0x5d9   : > { %3917 = vmatprep.mubr.msk.f32.mxu0 %vm1556_vm3, %v1902_v44 }
 0x5dc   : > { %3918 = vmatmul.mubr.msk.f32.gmra.mrb[44].mxu0 %vm1556_vm3, %v1904_v37 }
 0x5dd   : > { %3920 = vmatprep.mubr.msk.f32.mxu0 %vm1556_vm3, %v1906_v14 }
 0x5e0   : > { %3921 = vmatmul.mubr.msk.f32.gmra.mrb[46].mxu0 %vm1556_vm3, %v1908_v8 }
 0x5f0   : > { %v5589_v46 = vpop.f32.mrb[24].mxu0 }
 0x5f1   : > { %v5591_v2 = vpop.f32.mrb[25].mxu0 }
 0x5f8   : > { %v5593_v35 = vpop.f32.mrb[26].mxu0 }
 0x5f9   : > { %v5595_v6 = vpop.f32.mrb[27].mxu0 }
 0x5fc   : > { %v5597_v9 = vpop.f32.mrb[28].mxu0 }
 0x5fd   : > { %v5599_v56 = vpop.f32.mrb[29].mxu0 }
 0x603   : > { %v5601_v11 = vpop.f32.mrb[30].mxu0 }
 0x604   : > { %v5603_v3 = vpop.f32.mrb[31].mxu0 }
 0x64c   : > { %v3857_v27 = vpop.f32.mrb[32].mxu0 }
 0x64d   : > { %2531 = vrot.lane.b32.xlu1 %v3857_v27, %s4644_s28  ;;  %v2176_v12 = vpop.f32.mrb[33].mxu0 }
 0x64e   : > { %2529 = vrot.lane.b32.xlu0 %v2176_v12, %s4644_s28 }
 0x652   : > { %v3860_v61 = vpop.f32.mrb[34].mxu0 }
 0x653   : > { %v2186_v51 = vpop.f32.mrb[35].mxu0 }
 0x65c   : > { %v3863_v13 = vpop.f32.mrb[36].mxu0 }
 0x65d   : > { %v2196_v40 = vpop.f32.mrb[37].mxu0 }
 0x669   : > { %v3866_v26 = vpop.f32.mrb[38].mxu0 }
 0x66a   : > { %v2206_v18 = vpop.f32.mrb[39].mxu0 }
 0x67b   : > { %v3885_v4 = vpop.f32.mrb[16].mxu1 }
 0x67c   : > { %2563 = vrot.lane.b32.xlu1 %v3885_v4, %s4645_s15  ;;  %v2329_v1 = vpop.f32.mrb[17].mxu1 }
 0x67d   : > { %2561 = vrot.lane.b32.xlu0 %v2329_v1, %s4645_s15 }
 0x67f   : > { %v3888_v49 = vpop.f32.mrb[18].mxu1 }
 0x680   : > { %2535 = vrot.lane.b32.xlu1 %v3860_v61, %s4644_s28  ;;  %v2339_v34 = vpop.f32.mrb[19].mxu1 }
 0x681   : > { %2533 = vrot.lane.b32.xlu0 %v2186_v51, %s4644_s28 }
 0x683   : > { %v3891_v19 = vpop.f32.mrb[20].mxu1 }
 0x684   : > { %2567 = vrot.lane.b32.xlu1 %v3888_v49, %s4645_s15  ;;  %v2349_v59 = vpop.f32.mrb[21].mxu1 }
 0x685   : > { %2565 = vrot.lane.b32.xlu0 %v2339_v34, %s4645_s15 }
 0x687   : > { %v3894_v7 = vpop.f32.mrb[22].mxu1 }
 0x688   : > { %2539 = vrot.lane.b32.xlu1 %v3863_v13, %s4644_s28  ;;  %v2359_v10 = vpop.f32.mrb[23].mxu1 }
 0x689   : > { %2537 = vrot.lane.b32.xlu0 %v2196_v40, %s4644_s28 }
 0x68c   : > { %2571 = vrot.lane.b32.xlu1 %v3891_v19, %s4645_s15 }
 0x68d   : > { %2569 = vrot.lane.b32.xlu0 %v2349_v59, %s4645_s15 }
 0x690   : > { %2543 = vrot.lane.b32.xlu1 %v3866_v26, %s4644_s28 }
 0x691   : > { %2541 = vrot.lane.b32.xlu0 %v2206_v18, %s4644_s28 }
 0x694   : > { %2575 = vrot.lane.b32.xlu1 %v3894_v7, %s4645_s15 }
 0x695   : > { %2573 = vrot.lane.b32.xlu0 %v2359_v10, %s4645_s15 }
 0x6a7   : > { %v3913_v36 = vpop.f32.mrb[40].mxu0 }
 0x6a8   : > { %2595 = vrot.lane.b32.xlu1 %v3913_v36, %s4646_s26  ;;  %v2482_v29 = vpop.f32.mrb[41].mxu0 }
 0x6a9   : > { %2593 = vrot.lane.b32.xlu0 %v2482_v29, %s4646_s26 }
 0x6ab   : > { %v3916_v16 = vpop.f32.mrb[42].mxu0 }
 0x6ac   : > { %2599 = vrot.lane.b32.xlu1 %v3916_v16, %s4646_s26  ;;  %v2492_v54 = vpop.f32.mrb[43].mxu0 }
 0x6ad   : > { %2597 = vrot.lane.b32.xlu0 %v2492_v54, %s4646_s26 }
 0x6af   : > { %v3919_v41 = vpop.f32.mrb[44].mxu0 }
 0x6b0   : > { %2603 = vrot.lane.b32.xlu1 %v3919_v41, %s4646_s26  ;;  %v2502_v62 = vpop.f32.mrb[45].mxu0 }
 0x6b1   : > { %2601 = vrot.lane.b32.xlu0 %v2502_v62, %s4646_s26 }
 0x6b3   : > { %v3922_v28 = vpop.f32.mrb[46].mxu0 }
 0x6b4   : > { %2607 = vrot.lane.b32.xlu1 %v3922_v28, %s4646_s26  ;;  %v2512_v38 = vpop.f32.mrb[47].mxu0 }
 0x6b5   : > { %2605 = vrot.lane.b32.xlu0 %v2512_v38, %s4646_s26  ;;  %v4590_v38 = vld [vmem:[%s4777_s17 + $0x18] sm:$0xff] }
 0x6bf   : > { %v2532_v30 = vpop.permute.xlu1 %2531 }
 0x6c0   : > { %v2530_v23 = vpop.permute.xlu0 %2529  ;;  %v2618_v21 = vsel %vm927_vm1, %v5589_v46, %v2532_v30 }
 0x6c1   : > { %v2617_v31 = vsel %vm927_vm1, %v5591_v2, %v2530_v23 }
 0x6ee   : > { %v2564_v58 = vpop.permute.xlu1 %2563 }
 0x6ef   : > { %v2562_v24 = vpop.permute.xlu0 %2561  ;;  %v2627_v22 = vsel %vm2625_vm4, %v2618_v21, %v2564_v58  ;;  %v4594_v21 = vld [vmem:[%s4777_s17 + $0x38] sm:$0xff] }
 0x6f0   : > { %v2626_v47 = vsel %vm2625_vm4, %v2617_v31, %v2562_v24 }
 0x6f2   : > { %v2536_v42 = vpop.permute.xlu1 %2535 }
 0x6f3   : > { %v2534_v52 = vpop.permute.xlu0 %2533  ;;  %v2620_v46 = vsel %vm927_vm1, %v5593_v35, %v2536_v42 }
 0x6f4   : > { %v2619_v14 = vsel %vm927_vm1, %v5595_v6, %v2534_v52  ;;  %v4591_v52 = vld [vmem:[%s4777_s17 + $0x10] sm:$0xff] }
 0x6f6   : > { %v2568_v0 = vpop.permute.xlu1 %2567 }
 0x6f7   : > { %v2566_v48 = vpop.permute.xlu0 %2565  ;;  %v2629_v12 = vsel %vm2625_vm4, %v2620_v46, %v2568_v0 }
 0x6f8   : > { %v2628_v2 = vsel %vm2625_vm4, %v2619_v14, %v2566_v48 }
 0x6fa   : > { %v2540_v60 = vpop.permute.xlu1 %2539 }
 0x6fb   : > { %v2538_v53 = vpop.permute.xlu0 %2537  ;;  %v2622_v35 = vsel %vm927_vm1, %v5597_v9, %v2540_v60  ;;  %v4592_v60 = vld [vmem:[%s4777_s17 + $0x28] sm:$0xff] }
 0x6fc   : > { %v2621_v6 = vsel %vm927_vm1, %v5599_v56, %v2538_v53 }
 0x6fe   : > { %v2572_v32 = vpop.permute.xlu1 %2571 }
 0x6ff   : > { %v2570_v39 = vpop.permute.xlu0 %2569  ;;  %v2631_v18 = vsel %vm2625_vm4, %v2622_v35, %v2572_v32 }
 0x700   : > { %v2630_v40 = vsel %vm2625_vm4, %v2621_v6, %v2570_v39 }
 0x702   : > { %v2544_v43 = vpop.permute.xlu1 %2543 }
 0x703   : > { %v2542_v57 = vpop.permute.xlu0 %2541  ;;  %v2624_v9 = vsel %vm927_vm1, %v5601_v11, %v2544_v43 }
 0x704   : > { %v2623_v56 = vsel %vm927_vm1, %v5603_v3, %v2542_v57  ;;  %v3466_v3 = vld [vmem:[%s5904_s7] ss:$0 sm:$0xff] }
 0x706   : > { %v2576_v15 = vpop.permute.xlu1 %2575 }
 0x707   : > { %v2574_v55 = vpop.permute.xlu0 %2573  ;;  %v2633_v59 = vsel %vm2625_vm4, %v2624_v9, %v2576_v15  ;;  %v4593_v15 = vld [vmem:[%s4777_s17 + $0x20] sm:$0xff] }
 0x708   : > { %v2632_v34 = vsel %vm2625_vm4, %v2623_v56, %v2574_v55 }
 0x71a   : > { %v2596_v63 = vpop.permute.xlu1 %2595 }
 0x71b   : > { %v2594_v44 = vpop.permute.xlu0 %2593  ;;  %v2636_v45 = vsel %vm2634_vm5, %v2627_v22, %v2596_v63  ;;  %v4595_v22 = vld [vmem:[%s4777_s17 + $0x30] sm:$0xff] }
 0x71c   : > { %v2635_v37 = vsel %vm2634_vm5, %v2626_v47, %v2594_v44 }
 0x71d   : > { %3931 = vmatprep.mubr.msk.f32.mxu1 %vm491_vm0, %v2635_v37 }
 0x71e   : > { %3932 = vmatmul.mubr.msk.f32.vlgmr.msra.gmra.mrb[24].mxu1 %vm491_vm0, %v2636_v45  ;;  %v2600_v8 = vpop.permute.xlu1 %2599 }
 0x71f   : > { %v2598_v27 = vpop.permute.xlu0 %2597  ;;  %v2638_v51 = vsel %vm2634_vm5, %v2629_v12, %v2600_v8 }
 0x720   : > { %v2637_v61 = vsel %vm2634_vm5, %v2628_v2, %v2598_v27 }
 0x721   : > { %3934 = vmatprep.mubr.msk.f32.mxu1 %vm491_vm0, %v2637_v61 }
 0x722   : > { %3935 = vmatmul.mubr.msk.f32.gmra.mrb[26].mxu1 %vm491_vm0, %v2638_v51  ;;  %v2604_v13 = vpop.permute.xlu1 %2603 }
 0x723   : > { %v2602_v26 = vpop.permute.xlu0 %2601  ;;  %v2640_v1 = vsel %vm2634_vm5, %v2631_v18, %v2604_v13 }
 0x724   : > { %v2639_v4 = vsel %vm2634_vm5, %v2630_v40, %v2602_v26 }
 0x725   : > { %3937 = vmatprep.mubr.msk.f32.mxu1 %vm491_vm0, %v2639_v4 }
 0x726   : > { %3938 = vmatmul.mubr.msk.f32.gmra.mrb[28].mxu1 %vm491_vm0, %v2640_v1  ;;  %v2608_v49 = vpop.permute.xlu1 %2607 }
 0x727   : > { %v2606_v19 = vpop.permute.xlu0 %2605  ;;  %v2642_v10 = vsel %vm2634_vm5, %v2633_v59, %v2608_v49 }
 0x728   : > { %v2641_v7 = vsel %vm2634_vm5, %v2632_v34, %v2606_v19 }
 0x729   : > { %3940 = vmatprep.mubr.msk.f32.mxu1 %vm491_vm0, %v2641_v7 }
 0x72a   : > { %3941 = vmatmul.mubr.msk.f32.gmra.mrb[30].mxu1 %vm491_vm0, %v2642_v10 }
 0x7f1   : > { %v3933_v25 = vpop.f32.mrb[24].mxu1 }
 0x7f2   : > { %v2750_v11 = vadd.f32 %v3933_v25, %v3466_v3  ;;  %v2744_v50 = vpop.f32.mrb[25].mxu1 }
 0x7f3   : > { %v2745_v20 = vadd.f32 %v3466_v3, %v2744_v50 }
 0x7f4   : > { %v5677_v17 = vadd.f32 %v4588_v5, %v2750_v11 }
 0x7f5   : > { %v5680_v36 = vadd.f32 %v4589_v33, %v2745_v20  ;;  %v3936_v29 = vpop.f32.mrb[26].mxu1 }
 0x7f6   : > { %v2760_v16 = vadd.f32 %v3936_v29, %v3466_v3  ;;  %v2754_v54 = vpop.f32.mrb[27].mxu1  ;;  %v2794_v41 = vsel %vm491_vm0, %v5677_v17, 0.0 }
 0x7f7   : > { %v2755_v62 = vadd.f32 %v3466_v3, %v2754_v54  ;;  %2795 = vadd.xlane.f32.xlu1 %v2794_v41  ;;  %v2791_v28 = vsel %vm491_vm0, %v5680_v36, 0.0 }
 0x7f8   : > { %v5687_v30 = vadd.f32 %v4590_v38, %v2760_v16  ;;  %2792 = vadd.xlane.f32.xlu0 %v2791_v28 }
 0x7f9   : > { %v3939_v23 = vpop.f32.mrb[28].mxu1  ;;  %v5692_v0 = vadd.f32 %v4591_v52, %v2755_v62  ;;  %v2926_v52 = vld [vmem:[%s5907_s10 + $0x8] sm:$0xff] }
 0x7fa   : > { %v2770_v58 = vadd.f32 %v3939_v23, %v3466_v3  ;;  %v2764_v24 = vpop.f32.mrb[29].mxu1  ;;  %v2800_v42 = vsel %vm491_vm0, %v5687_v30, 0.0 }
 0x7fb   : > { %v2765_v48 = vadd.f32 %v3466_v3, %v2764_v24  ;;  %v2797_v63 = vsel %vm491_vm0, %v5692_v0, 0.0 }
 0x7fc   : > { %v5695_v53 = vadd.f32 %v4592_v60, %v2770_v58  ;;  %2801 = vadd.xlane.f32.xlu0 %v2800_v42  ;;  %v2925_v42 = vld [vmem:[%s5907_s10] sm:$0xff]  ;;  %v2927_v60 = vld [vmem:[%s5907_s10 + $0x10] sm:$0xff] }
 0x7fd   : > { %v3942_v32 = vpop.f32.mrb[30].mxu1  ;;  %v5700_v55 = vadd.f32 %v4593_v15, %v2765_v48  ;;  %v4183_v48 = vpack.c.bf16 %v2926_v52, %v2925_v42 }
 0x7fe   : > { %v2780_v39 = vadd.f32 %v3942_v32, %v3466_v3  ;;  %v2774_v43 = vpop.f32.mrb[31].mxu1  ;;  %v2806_v57 = vsel %vm491_vm0, %v5695_v53, 0.0  ;;  %v2928_v32 = vld [vmem:[%s5907_s10 + $0x18] sm:$0xff] }
 0x7ff   : > { %v2775_v31 = vadd.f32 %v3466_v3, %v2774_v43  ;;  %2807 = vadd.xlane.f32.xlu1 %v2806_v57  ;;  %v2803_v45 = vsel %vm491_vm0, %v5700_v55, 0.0  ;;  %4184 = vmatprep.subr.bf16.mxu0 %v4183_v48  ;;  %v3137_v43 = vld [vmem:[%s5909_s12] sm:$0xff]  ;;  %v3138_v57 = vld [vmem:[%s5909_s12 + $0x8] sm:$0xff] }
 0x800   : > { %v5705_v47 = vadd.f32 %v4594_v21, %v2780_v39  ;;  %2798 = vadd.xlane.f32.xlu0 %v2797_v63  ;;  %4186 = vmatpush3.bf16.msra.mxu0 %v4183_v48  ;;  %v4187_v39 = vpack.c.bf16 %v2928_v32, %v2927_v60  ;;  %v4191_v15 = vpack.c.bf16 %v3138_v57, %v3137_v43 }
 0x801   : > { %v5710_v37 = vadd.f32 %v4595_v22, %v2775_v31 }
 0x802   : > { %v2812_v44 = vsel %vm491_vm0, %v5705_v47, 0.0  ;;  %4188 = vmatprep.subr.bf16.mxu0 %v4187_v39  ;;  %4192 = vmatprep.subr.bf16.mxu1 %v4191_v15 }
 0x803   : > { %2813 = vadd.xlane.f32.xlu1 %v2812_v44  ;;  %v2809_v14 = vsel %vm491_vm0, %v5710_v37, 0.0  ;;  %4194 = vmatpush3.bf16.msra.mxu1 %v4191_v15 }
 0x804   : > { %2804 = vadd.xlane.f32.xlu0 %v2803_v45  ;;  %4190 = vmatpush3.bf16.msra.mxu0 %v4187_v39 }
 0x808   : > { %2810 = vadd.xlane.f32.xlu0 %v2809_v14 }
 0x884   : > { %v2796_v8 = vpop.xlane.xlu1 %2795 }
 0x885   : > { %v2816_v46 = vmul.f32 0.03125, %v2796_v8  ;;  %v2793_v2 = vpop.xlane.xlu0 %2792 }
 0x886   : > { %v2815_v27 = vmul.f32 0.03125, %v2793_v2 }
 0x887   : > { %v5717_v12 = vsub.f32 %v5677_v17, %v2816_v46 }
 0x888   : > { %v5720_v61 = vsub.f32 %v5680_v36, %v2815_v27 }
 0x889   : > { %v2802_v51 = vpop.xlane.xlu0 %2801  ;;  %v2832_v6 = vmul.f32 %v5717_v12, %v5717_v12 }
 0x88a   : > { %v2818_v13 = vmul.f32 0.03125, %v2802_v51  ;;  %v2831_v35 = vmul.f32 %v5720_v61, %v5720_v61 }
 0x88b   : > { %v2842_v40 = vsel %vm491_vm0, %v2832_v6, 0.0 }
 0x88c   : > { %v5728_v26 = vsub.f32 %v5687_v30, %v2818_v13  ;;  %v2808_v18 = vpop.xlane.xlu1 %2807  ;;  %2843 = vadd.xlane.f32.xlu1 %v2842_v40  ;;  %v2839_v4 = vsel %vm491_vm0, %v2831_v35, 0.0 }
 0x88d   : > { %v2820_v1 = vmul.f32 0.03125, %v2808_v18  ;;  %2840 = vadd.xlane.f32.xlu0 %v2839_v4  ;;  %v2799_v56 = vpop.xlane.xlu0 %2798 }
 0x88e   : > { %v2817_v49 = vmul.f32 0.03125, %v2799_v56  ;;  %v2834_v9 = vmul.f32 %v5728_v26, %v5728_v26 }
 0x88f   : > { %v5734_v34 = vsub.f32 %v5695_v53, %v2820_v1 }
 0x890   : > { %v5737_v19 = vsub.f32 %v5692_v0, %v2817_v49  ;;  %v2814_v59 = vpop.xlane.xlu1 %2813  ;;  %v2848_v7 = vsel %vm491_vm0, %v2834_v9, 0.0  ;;  %v3475_v49 = vld [vmem:[%s5905_s8] ss:$0 sm:$0xff] }
 0x891   : > { %v2822_v10 = vmul.f32 0.03125, %v2814_v59  ;;  %2849 = vadd.xlane.f32.xlu1 %v2848_v7  ;;  %v2805_v3 = vpop.xlane.xlu0 %2804  ;;  %v2836_v25 = vmul.f32 %v5734_v34, %v5734_v34 }
 0x892   : > { %v2819_v11 = vmul.f32 0.03125, %v2805_v3  ;;  %v2833_v50 = vmul.f32 %v5737_v19, %v5737_v19 }
 0x893   : > { %v5745_v20 = vsub.f32 %v5705_v47, %v2822_v10  ;;  %v2854_v5 = vsel %vm491_vm0, %v2836_v25, 0.0 }
 0x894   : > { %v5749_v33 = vsub.f32 %v5700_v55, %v2819_v11  ;;  %v2845_v29 = vsel %vm491_vm0, %v2833_v50, 0.0  ;;  %v3476_v11 = vld [vmem:[%s5906_s9] ss:$0 sm:$0xff] }
 0x895   : > { %2855 = vadd.xlane.f32.xlu1 %v2854_v5  ;;  %2846 = vadd.xlane.f32.xlu0 %v2845_v29  ;;  %v2811_v16 = vpop.xlane.xlu0 %2810  ;;  %v2838_v54 = vmul.f32 %v5745_v20, %v5745_v20 }
 0x896   : > { %v2821_v41 = vmul.f32 0.03125, %v2811_v16  ;;  %v2835_v62 = vmul.f32 %v5749_v33, %v5749_v33 }
 0x897   : > { %v2860_v28 = vsel %vm491_vm0, %v2838_v54, 0.0 }
 0x898   : > { %v5758_v38 = vsub.f32 %v5710_v37, %v2821_v41  ;;  %v2851_v23 = vsel %vm491_vm0, %v2835_v62, 0.0 }
 0x899   : > { %2861 = vadd.xlane.f32.xlu1 %v2860_v28  ;;  %2852 = vadd.xlane.f32.xlu0 %v2851_v23 }
 0x89a   : > { %v2837_v58 = vmul.f32 %v5758_v38, %v5758_v38 }
 0x89c   : > { %v2857_v24 = vsel %vm491_vm0, %v2837_v58, 0.0 }
 0x89d   : > { %2858 = vadd.xlane.f32.xlu0 %v2857_v24 }
 0x919   : > { %v2844_v31 = vpop.xlane.xlu1 %2843 }
 0x91a   : > { %v2864_v63 = vmul.f32 0.03125, %v2844_v31  ;;  %v2841_v21 = vpop.xlane.xlu0 %2840 }
 0x91b   : > { %v2863_v44 = vmul.f32 0.03125, %v2841_v21 }
 0x91c   : > { %v2872_v22 = vadd.f32 1e-05, %v2864_v63 }
 0x91d   : > { %v2871_v45 = vadd.f32 1e-05, %v2863_v44  ;;  %v3139_v44 = vld [vmem:[%s5909_s12 + $0x10] sm:$0xff] }
 0x91e   : > { %4556 = vrsqrt.f32 %v2872_v22  ;;  %v2850_v14 = vpop.xlane.xlu1 %2849 }
 0x91f   : > { %4558 = vrsqrt.f32 %v2871_v45  ;;  %v2866_v8 = vmul.f32 0.03125, %v2850_v14  ;;  %v3141_v45 = vld [vmem:[%s5909_s12 + $0x20] sm:$0xff]  ;;  %v3142_v14 = vld [vmem:[%s5909_s12 + $0x28] sm:$0xff] }
 0x921   : > { %v2874_v46 = vadd.f32 1e-05, %v2866_v8  ;;  %v4199_v8 = vpack.c.bf16 %v3142_v14, %v3141_v45 }
 0x922   : > { %v2856_v2 = vpop.xlane.xlu1 %2855  ;;  %v2847_v27 = vpop.xlane.xlu0 %2846 }
 0x923   : > { %4560 = vrsqrt.f32 %v2874_v46  ;;  %v2868_v51 = vmul.f32 0.03125, %v2856_v2  ;;  %v2865_v6 = vmul.f32 0.03125, %v2847_v27  ;;  %v3143_v46 = vld [vmem:[%s5909_s12 + $0x30] sm:$0xff]  ;;  %v3144_v2 = vld [vmem:[%s5909_s12 + $0x38] sm:$0xff] }
 0x924   : > { %v4203_v27 = vpack.c.bf16 %v3144_v2, %v3143_v46 }
 0x925   : > { %v2876_v13 = vadd.f32 1e-05, %v2868_v51  ;;  %v2873_v35 = vadd.f32 1e-05, %v2865_v6  ;;  %v3145_v51 = vld [vmem:[%s5909_s12 + $0x40] sm:$0xff]  ;;  %v3146_v6 = vld [vmem:[%s5909_s12 + $0x48] sm:$0xff] }
 0x926   : > { %v2862_v40 = vpop.xlane.xlu1 %2861  ;;  %v2853_v18 = vpop.xlane.xlu0 %2852 }
 0x927   : > { %4562 = vrsqrt.f32 %v2876_v13  ;;  %v2870_v4 = vmul.f32 0.03125, %v2862_v40  ;;  %v2867_v1 = vmul.f32 0.03125, %v2853_v18  ;;  %v4207_v13 = vpack.c.bf16 %v3146_v6, %v3145_v51  ;;  %v3148_v40 = vld [vmem:[%s5909_s12 + $0x58] sm:$0xff] }
 0x928   : > { %v4557_v56 = vpop.eup %4556  ;;  %4564 = vrsqrt.f32 %v2873_v35  ;;  %v3147_v35 = vld [vmem:[%s5909_s12 + $0x50] sm:$0xff] }
 0x929   : > { %v4559_v9 = vpop.eup %4558  ;;  %v2888_v59 = vmul.f32 %v4557_v56, %v5717_v12  ;;  %v2878_v7 = vadd.f32 1e-05, %v2870_v4  ;;  %v2875_v10 = vadd.f32 1e-05, %v2867_v1  ;;  %v4211_v18 = vpack.c.bf16 %v3148_v40, %v3147_v35  ;;  %v3149_v4 = vld [vmem:[%s5909_s12 + $0x60] sm:$0xff]  ;;  %v3150_v1 = vld [vmem:[%s5909_s12 + $0x68] sm:$0xff] }
 0x92a   : > { %v2859_v3 = vpop.xlane.xlu0 %2858  ;;  %v2887_v25 = vmul.f32 %v4559_v9, %v5720_v61  ;;  %v4215_v56 = vpack.c.bf16 %v3150_v1, %v3149_v4  ;;  %v3152_v9 = vld [vmem:[%s5909_s12 + $0x78] sm:$0xff] }
 0x92b   : > { %v2903_v50 = vmul.f32 %v3475_v49, %v2888_v59  ;;  %4566 = vrsqrt.f32 %v2878_v7  ;;  %v2869_v5 = vmul.f32 0.03125, %v2859_v3  ;;  %v3477_v7 = vld [vmem:[%s5908_s11] ss:$0 sm:$0xff] }
 0x92c   : > { %4568 = vrsqrt.f32 %v2875_v10  ;;  %v2902_v29 = vmul.f32 %v3475_v49, %v2887_v25 }
 0x92d   : > { %v4561_v16 = vpop.eup %4560  ;;  %v2877_v54 = vadd.f32 1e-05, %v2869_v5  ;;  %v2918_v62 = vadd.f32 %v3476_v11, %v2903_v50 }
 0x92e   : > { %v2917_v41 = vadd.f32 %v3476_v11, %v2902_v29  ;;  %v2890_v12 = vmul.f32 %v4561_v16, %v5728_v26 }
 0x92f   : > { %4570 = vrsqrt.f32 %v2877_v54 }
 0x930   : > { %3951 = vmatprep.mubr.msk.f32.mxu0 %vm491_vm0, %v2917_v41  ;;  %v2905_v58 = vmul.f32 %v3475_v49, %v2890_v12 }
 0x931   : > { %v4563_v28 = vpop.eup %4562  ;;  %3952 = vmatmul.mubr.msk.f32.vlgmr.msra.gmra.mrb[48].mxu0 %vm491_vm0, %v2918_v62 }
 0x932   : > { %v4565_v61 = vpop.eup %4564  ;;  %v2892_v24 = vmul.f32 %v4563_v28, %v5734_v34  ;;  %v2920_v39 = vadd.f32 %v3476_v11, %v2905_v58 }
 0x933   : > { %v2889_v23 = vmul.f32 %v4565_v61, %v5737_v19 }
 0x934   : > { %v2907_v43 = vmul.f32 %v3475_v49, %v2892_v24 }
 0x935   : > { %v4567_v42 = vpop.eup %4566  ;;  %v2904_v52 = vmul.f32 %v3475_v49, %v2889_v23 }
 0x936   : > { %v4569_v48 = vpop.eup %4568  ;;  %v2894_v57 = vmul.f32 %v4567_v42, %v5745_v20  ;;  %v2922_v34 = vadd.f32 %v3476_v11, %v2907_v43 }
 0x937   : > { %v2919_v60 = vadd.f32 %v3476_v11, %v2904_v52  ;;  %v2891_v32 = vmul.f32 %v4569_v48, %v5749_v33 }
 0x938   : > { %v2909_v21 = vmul.f32 %v3475_v49, %v2894_v57 }
 0x939   : > { %v4571_v26 = vpop.eup %4570  ;;  %3954 = vmatprep.mubr.msk.f32.mxu0 %vm491_vm0, %v2919_v60  ;;  %v2906_v15 = vmul.f32 %v3475_v49, %v2891_v32 }
 0x93a   : > { %3955 = vmatmul.mubr.msk.f32.gmra.mrb[50].mxu0 %vm491_vm0, %v2920_v39  ;;  %v2893_v19 = vmul.f32 %v4571_v26, %v5758_v38  ;;  %v2924_v20 = vadd.f32 %v3476_v11, %v2909_v21  ;;  %v3140_v38 = vld [vmem:[%s5909_s12 + $0x18] sm:$0xff] }
 0x93b   : > { %v2921_v31 = vadd.f32 %v3476_v11, %v2906_v15  ;;  %v4195_v22 = vpack.c.bf16 %v3140_v38, %v3139_v44 }
 0x93c   : > { %v2908_v63 = vmul.f32 %v3475_v49, %v2893_v19  ;;  %v3151_v49 = vld [vmem:[%s5909_s12 + $0x70] sm:$0xff] }
 0x93d   : > { %3957 = vmatprep.mubr.msk.f32.mxu0 %vm491_vm0, %v2921_v31  ;;  %4196 = vmatprep.subr.bf16.mxu1 %v4195_v22  ;;  %v4219_v59 = vpack.c.bf16 %v3152_v9, %v3151_v49 }
 0x93e   : > { %3958 = vmatmul.mubr.msk.f32.gmra.mrb[52].mxu0 %vm491_vm0, %v2922_v34  ;;  %v2923_v33 = vadd.f32 %v3476_v11, %v2908_v63  ;;  %4198 = vmatpush3.bf16.msra.mxu1 %v4195_v22 }
 0x93f   : > { %4200 = vmatprep.subr.bf16.mxu1 %v4199_v8 }
 0x940   : > { %3960 = vmatprep.mubr.msk.f32.mxu0 %vm491_vm0, %v2923_v33 }
 0x942   : > { %3961 = vmatmul.mubr.msk.f32.gmra.mrb[54].mxu0 %vm491_vm0, %v2924_v20  ;;  %4202 = vmatpush3.bf16.msra.mxu1 %v4199_v8 }
 0x943   : > { %4204 = vmatprep.subr.bf16.mxu1 %v4203_v27 }
 0x946   : > { %4206 = vmatpush3.bf16.msra.mxu1 %v4203_v27 }
 0x947   : > { %4208 = vmatprep.subr.bf16.mxu1 %v4207_v13 }
 0x94a   : > { %4210 = vmatpush3.bf16.msra.mxu1 %v4207_v13 }
 0x94b   : > { %4212 = vmatprep.subr.bf16.mxu1 %v4211_v18 }
 0x94e   : > { %4214 = vmatpush3.bf16.msra.mxu1 %v4211_v18 }
 0x94f   : > { %4216 = vmatprep.subr.bf16.mxu1 %v4215_v56 }
 0x952   : > { %4218 = vmatpush3.bf16.msra.mxu1 %v4215_v56 }
 0x953   : > { %4220 = vmatprep.subr.bf16.mxu1 %v4219_v59 }
 0x956   : > { %4222 = vmatpush3.bf16.msra.mxu1 %v4219_v59 }
 0xa04   : > { %v3953_v10 = vpop.f32.mrb[48].mxu0 }
 0xa05   : > { %v3032_v3 = vadd.f32 %v3953_v10, %v3477_v7  ;;  %v3026_v25 = vpop.f32.mrb[49].mxu0 }
 0xa06   : > { %v3027_v11 = vadd.f32 %v3477_v7, %v3026_v25 }
 0xa07   : > { %v3074_v50 = vmul.f32 %v3032_v3, %v3032_v3  ;;  %v3066_v25 = vmul.f32 0.5, %v3032_v3 }
 0xa08   : > { %v3073_v5 = vmul.f32 %v3027_v11, %v3027_v11 }
 0xa09   : > { %v3082_v29 = vmul.f32 %v3074_v50, %v3032_v3 }
 0xa0a   : > { %v3081_v16 = vmul.f32 %v3073_v5, %v3027_v11 }
 0xa0b   : > { %v3090_v54 = vmul.f32 0.044715, %v3082_v29 }
 0xa0c   : > { %v3089_v41 = vmul.f32 0.044715, %v3081_v16 }
 0xa0d   : > { %v3098_v62 = vadd.f32 %v3090_v54, %v3032_v3  ;;  %v3956_v12 = vpop.f32.mrb[50].mxu0 }
 0xa0e   : > { %v3097_v28 = vadd.f32 %v3089_v41, %v3027_v11  ;;  %v5849_v61 = vadd.f32 %v3956_v12, %v3477_v7  ;;  %v3036_v23 = vpop.f32.mrb[51].mxu0 }
 0xa0f   : > { %v3106_v58 = vmul.f32 0.7978846, %v3098_v62  ;;  %v3037_v24 = vadd.f32 %v3477_v7, %v3036_v23 }
 0xa10   : > { %v3105_v42 = vmul.f32 0.7978846, %v3097_v28  ;;  %v3076_v52 = vmul.f32 %v5849_v61, %v5849_v61  ;;  %v3068_v3 = vmul.f32 0.5, %v5849_v61 }
 0xa11   : > { %4572 = vtanh.f32 %v3106_v58  ;;  %v3075_v48 = vmul.f32 %v3037_v24, %v3037_v24  ;;  %v3959_v60 = vpop.f32.mrb[52].mxu0  ;;  %v3067_v23 = vmul.f32 0.5, %v3037_v24 }
 0xa12   : > { %v3084_v32 = vmul.f32 %v3076_v52, %v5849_v61  ;;  %v5854_v39 = vadd.f32 %v3959_v60, %v3477_v7  ;;  %v3046_v43 = vpop.f32.mrb[53].mxu0  ;;  %4574 = vtanh.f32 %v3105_v42 }
 0xa13   : > { %v3083_v57 = vmul.f32 %v3075_v48, %v3037_v24  ;;  %v3047_v26 = vadd.f32 %v3477_v7, %v3046_v43 }
 0xa14   : > { %v3092_v15 = vmul.f32 0.044715, %v3084_v32  ;;  %v3078_v19 = vmul.f32 %v5854_v39, %v5854_v39 }
 0xa15   : > { %v3091_v31 = vmul.f32 0.044715, %v3083_v57  ;;  %v3077_v34 = vmul.f32 %v3047_v26, %v3047_v26  ;;  %v3962_v63 = vpop.f32.mrb[54].mxu0  ;;  %v3069_v32 = vmul.f32 0.5, %v3047_v26  ;;  %v3070_v57 = vmul.f32 0.5, %v5854_v39 }
 0xa16   : > { %v3100_v21 = vadd.f32 %v3092_v15, %v5849_v61  ;;  %v3086_v33 = vmul.f32 %v3078_v19, %v5854_v39  ;;  %v5860_v20 = vadd.f32 %v3962_v63, %v3477_v7  ;;  %v3056_v44 = vpop.f32.mrb[55].mxu0 }
 0xa17   : > { %v3099_v38 = vadd.f32 %v3091_v31, %v3037_v24  ;;  %v3085_v22 = vmul.f32 %v3077_v34, %v3047_v26  ;;  %v3057_v45 = vadd.f32 %v3477_v7, %v3056_v44  ;;  %v3065_v7 = vmul.f32 0.5, %v3027_v11 }
 0xa18   : > { %v3108_v14 = vmul.f32 0.7978846, %v3100_v21  ;;  %v3094_v8 = vmul.f32 0.044715, %v3086_v33  ;;  %v3080_v46 = vmul.f32 %v5860_v20, %v5860_v20  ;;  %v3072_v21 = vmul.f32 0.5, %v5860_v20 }
 0xa19   : > { %v3107_v2 = vmul.f32 0.7978846, %v3099_v38  ;;  %v3093_v27 = vmul.f32 0.044715, %v3085_v22  ;;  %v3079_v51 = vmul.f32 %v3057_v45, %v3057_v45  ;;  %v3071_v63 = vmul.f32 0.5, %v3057_v45 }
 0xa1a   : > { %v3102_v6 = vadd.f32 %v3094_v8, %v5854_v39  ;;  %v3088_v13 = vmul.f32 %v3080_v46, %v5860_v20  ;;  %4576 = vtanh.f32 %v3108_v14  ;;  %v3486_v39 = vld [vmem:[%s5910_s13] ss:$0 sm:$0xff] }
 0xa1b   : > { %v4573_v35 = vpop.eup %4572  ;;  %v3101_v40 = vadd.f32 %v3093_v27, %v3047_v26  ;;  %v3087_v18 = vmul.f32 %v3079_v51, %v3057_v45  ;;  %4578 = vtanh.f32 %v3107_v2 }
 0xa1c   : > { %v4575_v4 = vpop.eup %4574  ;;  %v3122_v1 = vadd.f32 1.0, %v4573_v35  ;;  %v3110_v56 = vmul.f32 0.7978846, %v3102_v6  ;;  %v3096_v49 = vmul.f32 0.044715, %v3088_v13 }
 0xa1d   : > { %v3109_v9 = vmul.f32 0.7978846, %v3101_v40  ;;  %v3095_v59 = vmul.f32 0.044715, %v3087_v18  ;;  %v3121_v10 = vadd.f32 1.0, %v4575_v4 }
 0xa1e   : > { %v3104_v50 = vadd.f32 %v3096_v49, %v5860_v20  ;;  %4580 = vtanh.f32 %v3110_v56  ;;  %v3130_v16 = vmul.f32 %v3122_v1, %v3066_v25 }
 0xa1f   : > { %v3103_v5 = vadd.f32 %v3095_v59, %v3057_v45  ;;  %v3129_v29 = vmul.f32 %v3121_v10, %v3065_v7  ;;  %4582 = vtanh.f32 %v3109_v9 }
 0xa20   : > { %v3112_v54 = vmul.f32 0.7978846, %v3104_v50 }
 0xa21   : > { %v3111_v41 = vmul.f32 0.7978846, %v3103_v5  ;;  %3995 = vmatprep.mubr.f32.mxu1 %v3129_v29 }
 0xa22   : > { %3996 = vmatmul.mubr.f32.vlgmr.msra.gmra.mrb[32].mxu1 %v3130_v16  ;;  %4584 = vtanh.f32 %v3112_v54 }
 0xa23   : > { %4586 = vtanh.f32 %v3111_v41 }
 0xa24   : > { %v4577_v62 = vpop.eup %4576 }
 0xa25   : > { %v4579_v12 = vpop.eup %4578  ;;  %v3124_v28 = vadd.f32 1.0, %v4577_v62 }
 0xa26   : > { %v3123_v11 = vadd.f32 1.0, %v4579_v12 }
 0xa27   : > { %v3132_v48 = vmul.f32 %v3124_v28, %v3068_v3 }
 0xa28   : > { %v4581_v58 = vpop.eup %4580  ;;  %v3131_v42 = vmul.f32 %v3123_v11, %v3067_v23 }
 0xa29   : > { %v4583_v52 = vpop.eup %4582  ;;  %v3126_v60 = vadd.f32 1.0, %v4581_v58 }
 0xa2a   : > { %3998 = vmatprep.mubr.f32.mxu1 %v3131_v42  ;;  %v3125_v43 = vadd.f32 1.0, %v4583_v52 }
 0xa2b   : > { %3999 = vmatmul.mubr.f32.gmra.mrb[34].mxu1 %v3132_v48  ;;  %v3134_v34 = vmul.f32 %v3126_v60, %v3070_v57 }
 0xa2c   : > { %v4585_v15 = vpop.eup %4584  ;;  %v3133_v19 = vmul.f32 %v3125_v43, %v3069_v32 }
 0xa2d   : > { %v4587_v31 = vpop.eup %4586  ;;  %v3128_v24 = vadd.f32 1.0, %v4585_v15 }
 0xa2e   : > { %4001 = vmatprep.mubr.f32.mxu1 %v3133_v19  ;;  %v3127_v61 = vadd.f32 1.0, %v4587_v31 }
 0xa2f   : > { %4002 = vmatmul.mubr.f32.gmra.mrb[36].mxu1 %v3134_v34  ;;  %v3136_v44 = vmul.f32 %v3128_v24, %v3072_v21 }
 0xa30   : > { %v3135_v33 = vmul.f32 %v3127_v61, %v3071_v63 }
 0xa32   : > { %4004 = vmatprep.mubr.f32.mxu1 %v3135_v33 }
 0xa33   : > { %4005 = vmatmul.mubr.f32.gmra.mrb[38].mxu1 %v3136_v44 }
 0xaf5   : > { %v3997_v26 = vpop.f32.mrb[32].mxu1 }
 0xaf6   : > { %v3232_v38 = vadd.f32 %v3997_v26, %v3486_v39  ;;  %v3226_v22 = vpop.f32.mrb[33].mxu1 }
 0xaf7   : > { %v3227_v45 = vadd.f32 %v3486_v39, %v3226_v22 }
 0xaf8   : > { %v3266_v14 = vadd.f32 %v3232_v38, %v5677_v17 }
 0xaf9   : > { %v3265_v20 = vadd.f32 %v3227_v45, %v5680_v36 }
 0xafa   : > { %3274 = vst.msk [vmem:[%s482_s27 + $0x8] sm:$0xff] %vm491_vm0, %v3266_v14 }
 0xafb   : > { %3273 = vst.msk [vmem:[%s482_s27] sm:$0xff] %vm491_vm0, %v3265_v20 }
 0xafe   : > { %v4000_v8 = vpop.f32.mrb[34].mxu1 }
 0xaff   : > { %v3242_v46 = vadd.f32 %v4000_v8, %v3486_v39  ;;  %v3236_v2 = vpop.f32.mrb[35].mxu1 }
 0xb00   : > { %v3237_v27 = vadd.f32 %v3486_v39, %v3236_v2 }
 0xb01   : > { %v3268_v51 = vadd.f32 %v3242_v46, %v5687_v30 }
 0xb02   : > { %v3267_v6 = vadd.f32 %v3237_v27, %v5692_v0  ;;  %v4003_v13 = vpop.f32.mrb[36].mxu1 }
 0xb03   : > { %3276 = vst.msk [vmem:[%s482_s27 + $0x18] sm:$0xff] %vm491_vm0, %v3268_v51  ;;  %v3252_v35 = vadd.f32 %v4003_v13, %v3486_v39  ;;  %v3246_v40 = vpop.f32.mrb[37].mxu1 }
 0xb04   : > { %3275 = vst.msk [vmem:[%s482_s27 + $0x10] sm:$0xff] %vm491_vm0, %v3267_v6  ;;  %v3247_v17 = vadd.f32 %v3486_v39, %v3246_v40 }
 0xb05   : > { %v3270_v36 = vadd.f32 %v3252_v35, %v5695_v53 }
 0xb06   : > { %v3269_v18 = vadd.f32 %v3247_v17, %v5700_v55  ;;  %v4006_v4 = vpop.f32.mrb[38].mxu1 }
 0xb07   : > { %3278 = vst.msk [vmem:[%s482_s27 + $0x28] sm:$0xff] %vm491_vm0, %v3270_v36  ;;  %v3262_v1 = vadd.f32 %v4006_v4, %v3486_v39  ;;  %v3256_v56 = vpop.f32.mrb[39].mxu1 }
 0xb08   : > { %3277 = vst.msk [vmem:[%s482_s27 + $0x20] sm:$0xff] %vm491_vm0, %v3269_v18  ;;  %v3257_v30 = vadd.f32 %v3486_v39, %v3256_v56 }
 0xb09   : > { %v3272_v0 = vadd.f32 %v3262_v1, %v5705_v47 }
 0xb0a   : > { %v3271_v49 = vadd.f32 %v3257_v30, %v5710_v37 }
 0xb0b   : > { %3280 = vst.msk [vmem:[%s482_s27 + $0x38] sm:$0xff] %vm491_vm0, %v3272_v0 }
 0xb0c   : > { %3279 = vst.msk [vmem:[%s482_s27 + $0x30] sm:$0xff] %vm491_vm0, %v3271_v49 }
 0xb0d PF: > { %s25_s29 = sadd.s32 1, %s4634_s29  }
 0xb0e   : > { %p22_p3 = scmp.ge.s32.totalorder %s25_s29, 4  }
 0xb10   :  { %24 = sbr.rel (!%p22_p3) target bundleno = 1 (0x1), region = 111 }
 0xb17   :  { %3302 = vsyncpa [#allocation3], 1 }
 0xb18   :  { %3304 = vsyncpa [#allocation3 + $0x1], 1 }

</bundles_post_ra>
